<compile_context>
chip_gen: v7x
topology: tpu7x:2x2x1
jax: 0.10.0
libtpu: 0.0.40
codegen_flags: <defaults>
</compile_context>

<pallas_src>
from functools import partial
import math

import jax
import jax.numpy as jnp
from jax.experimental import pallas as pl
from jax.experimental.pallas import tpu as pltpu

BN_EPS = 1e-5
NEG_BIG = -1e30  # "-inf" stand-in that stays NaN-free through exp()


# ---------------------------------------------------------------------------
# shared math (used both inside the Pallas kernel and by the pure-JAX reference)
# ---------------------------------------------------------------------------
def _bn_train(x, gamma, beta):
    """BatchNorm1d, training mode: batch stats over axis 0, biased variance."""
    mu = jnp.mean(x, axis=0, keepdims=True)
    var = jnp.mean((x - mu) ** 2, axis=0, keepdims=True)
    return (x - mu) * jax.lax.rsqrt(var + BN_EPS) * gamma + beta


def _stem(x, bnfeat, wfeat):
    """bn_feat + conv_feat (GCNConv gfn=True -> x @ W) + relu."""
    x = _bn_train(x, bnfeat[0:1, :], bnfeat[1:2, :])
    return jnp.maximum(jnp.dot(x, wfeat, preferred_element_type=jnp.float32), 0.0)


def _gat_layer(x, adj, supp, w_lin, att_src_r, att_dst_c, gamma, beta, bias,
               heads, head_dim, neg_slope=0.2):
    """BatchNorm1d -> GATConv(heads, concat) -> ReLU, dense-adjacency formulation."""
    f32 = jnp.float32
    x = _bn_train(x, gamma, beta)
    z = jnp.dot(x, w_lin, preferred_element_type=f32)             # [N, heads*head_dim]
    # per-node per-head scores via MXU matmuls (block row/col embedded att vectors)
    s_dst = jnp.dot(z, att_dst_c, preferred_element_type=f32)     # [N, heads]
    s_src_t = jnp.einsum("hk,nk->hn", att_src_r, z,
                         preferred_element_type=f32)              # [heads, N]
    outs = []
    for h in range(heads):
        # e[i, j] = a_dst . z_i + a_src . z_j   (logit of edge j -> i)
        e = s_dst[:, h:h + 1] + s_src_t[h:h + 1, :]               # [N, N]
        e = jnp.where(e >= 0.0, e, neg_slope * e)                 # LeakyReLU(0.2)
        e = jnp.where(supp, e, NEG_BIG)                           # edges (+ self loop) only
        m = jnp.max(e, axis=1, keepdims=True)
        w = adj * jnp.exp(e - m)                                  # adj carries edge multiplicity
        attn = w / jnp.sum(w, axis=1, keepdims=True)
        # TODO(synk): GATConv applies dropout(p=0.2) to attn only in training; identity here.
        outs.append(jnp.dot(attn, z[:, h * head_dim:(h + 1) * head_dim],
                            preferred_element_type=f32))
    out = jnp.concatenate(outs, axis=-1) + bias                   # concat heads -> [N, hidden]
    return jnp.maximum(out, 0.0)


def _readout(h, pool, bnh, wc, bc):
    """global_add_pool -> bn_hidden -> (dropout=identity) -> lin_class -> log_softmax."""
    f32 = jnp.float32
    g = jnp.dot(pool, h, preferred_element_type=f32)              # [G, hidden]
    g = _bn_train(g, bnh[0:1, :], bnh[1:2, :])
    # TODO(synk): F.dropout(p=0.2, training=True) skipped (identity) for determinism.
    z = jnp.dot(g, wc, preferred_element_type=f32) + bc
    m = jnp.max(z, axis=-1, keepdims=True)
    lse = jnp.log(jnp.sum(jnp.exp(z - m), axis=-1, keepdims=True)) + m
    return z - lse


# ---------------------------------------------------------------------------
# Pallas kernel: grid axis = GAT layer index ("arbitrary"); node features kept
# in a persistent VMEM scratch; per-layer weights selected by BlockSpec index_map.
# ---------------------------------------------------------------------------
def _make_kernel(heads, head_dim):
    def kernel(x_ref, a_ref, p_ref,
               bnfeat_ref, wfeat_ref,
               bnconv_ref, wgat_ref, attsrc_ref, attdst_ref,
               bnh_ref, wc_ref, bc_ref,
               out_ref,
               h_scratch):
        f32 = jnp.float32
        layer = pl.program_id(0)

        # ---- stem (layer 0 only) ----
        @pl.when(layer == 0)
        def _():
            h_scratch[...] = _stem(x_ref[...], bnfeat_ref[...], wfeat_ref[...])

        # ---- this grid step's GAT layer ----
        adj = a_ref[...].astype(f32)            # bf16 counts -> f32 (exact)
        supp = adj > 0.0
        slab = bnconv_ref[0]                    # [3, hidden]: gamma, beta, GAT bias
        h_scratch[...] = _gat_layer(
            h_scratch[...], adj, supp,
            wgat_ref[0], attsrc_ref[0], attdst_ref[0],
            slab[0:1, :], slab[1:2, :], slab[2:3, :],
            heads, head_dim)

        # ---- head (last layer only) ----
        @pl.when(layer == pl.num_programs(0) - 1)
        def _():
            out_ref[...] = _readout(h_scratch[...], p_ref[...].astype(f32),
                                    bnh_ref[...], wc_ref[...], bc_ref[...])

    return kernel


# ---------------------------------------------------------------------------
# parameters (deterministic synthetic, PyG-like init: glorot weights/att, BN w=1 b=1e-4)
# ---------------------------------------------------------------------------
def init_params(key, f_in, hidden, n_classes, heads=4, num_convs=3):
    assert hidden % heads == 0
    head_dim = hidden // heads
    ks = jax.random.split(key, 3 * num_convs + 3)

    def glorot(k, shape, fan_in, fan_out):
        a = math.sqrt(6.0 / (fan_in + fan_out))
        return jax.random.uniform(k, shape, jnp.float32, -a, a)

    p = {}
    p["bnfeat"] = jnp.stack([jnp.ones((f_in,), jnp.float32),
                             jnp.full((f_in,), 1e-4, jnp.float32)])        # [2, F_in]
    # TODO(synk): GCNConv(gfn=True) returns x @ W before bias is applied; bias omitted.
    p["wfeat"] = glorot(ks[0], (f_in, hidden), f_in, hidden)

    bnconv, wgat, attsrc, attdst = [], [], [], []
    for l in range(num_convs):
        kw, ksrc, kdst = ks[1 + 3 * l], ks[2 + 3 * l], ks[3 + 3 * l]
        wgat.append(glorot(kw, (hidden, hidden), hidden, hidden))
        a_src = glorot(ksrc, (heads, head_dim), heads, head_dim)
        a_dst = glorot(kdst, (heads, head_dim), heads, head_dim)
        # embed per-head att vectors as block row / column matrices so that
        # attention scores come out of plain MXU matmuls inside the kernel
        src_r = jnp.zeros((heads, hidden), jnp.float32)
        dst_c = jnp.zeros((hidden, heads), jnp.float32)
        for h in range(heads):
            src_r = src_r.at[h, h * head_dim:(h + 1) * head_dim].set(a_src[h])
            dst_c = dst_c.at[h * head_dim:(h + 1) * head_dim, h].set(a_dst[h])
        attsrc.append(src_r)
        attdst.append(dst_c)
        # per-layer slab: row0 = BN gamma (1), row1 = BN beta (1e-4), row2 = GAT bias (0)
        bnconv.append(jnp.stack([jnp.ones((hidden,), jnp.float32),
                                 jnp.full((hidden,), 1e-4, jnp.float32),
                                 jnp.zeros((hidden,), jnp.float32)]))
    p["bnconv"] = jnp.stack(bnconv)          # [L, 3, hidden]
    p["wgat"] = jnp.stack(wgat)              # [L, hidden, hidden]
    p["attsrc"] = jnp.stack(attsrc)          # [L, heads, hidden]
    p["attdst"] = jnp.stack(attdst)          # [L, hidden, heads]

    p["bnh"] = jnp.stack([jnp.ones((hidden,), jnp.float32),
                          jnp.full((hidden,), 1e-4, jnp.float32)])         # [2, hidden]
    bound = 1.0 / math.sqrt(hidden)
    p["wc"] = jax.random.uniform(ks[3 * num_convs + 1], (hidden, n_classes),
                                 jnp.float32, -bound, bound)
    p["bc"] = jax.random.uniform(ks[3 * num_convs + 2], (1, n_classes),
                                 jnp.float32, -bound, bound)
    return p


# ---------------------------------------------------------------------------
# wrapper
# ---------------------------------------------------------------------------
@partial(jax.jit, static_argnames=("num_graphs", "heads"))
def gatnet_forward(x, edge_src, edge_dst, batch, num_graphs, params, heads=4):
    f32 = jnp.float32
    n_nodes, f_in = x.shape
    num_convs, _, hidden = params["wgat"].shape
    n_classes = params["wc"].shape[1]
    head_dim = hidden // heads

    # GATConv(add_self_loops=True): remove existing self loops, add exactly one.
    adj = jnp.zeros((n_nodes, n_nodes), f32).at[edge_dst, edge_src].add(1.0)
    eye = jnp.eye(n_nodes, dtype=f32)
    adj = adj * (1.0 - eye) + eye          # adj[i, j] = multiplicity of edge j -> i
    pool = (batch[None, :] == jnp.arange(num_graphs)[:, None]).astype(f32)

    # 0/1/small-count operands are exact in bf16 -> halve VMEM/DMA for the largest slabs
    adj_bf16 = adj.astype(jnp.bfloat16)
    pool_bf16 = pool.astype(jnp.bfloat16)

    operands = (x, adj_bf16, pool_bf16,
                params["bnfeat"], params["wfeat"],
                params["bnconv"], params["wgat"], params["attsrc"], params["attdst"],
                params["bnh"], params["wc"], params["bc"])

    in_specs = [
        pl.BlockSpec((n_nodes, f_in), lambda i: (0, 0)),          # x (used at layer 0)
        pl.BlockSpec((n_nodes, n_nodes), lambda i: (0, 0)),       # adjacency (resident)
        pl.BlockSpec((num_graphs, n_nodes), lambda i: (0, 0)),    # pooling matrix
        pl.BlockSpec((2, f_in), lambda i: (0, 0)),                # bn_feat gamma/beta
        pl.BlockSpec((f_in, hidden), lambda i: (0, 0)),           # conv_feat weight
        pl.BlockSpec((1, 3, hidden), lambda i: (i, 0, 0)),        # per-layer BN + GAT-bias slab
        pl.BlockSpec((1, hidden, hidden), lambda i: (i, 0, 0)),   # per-layer GAT lin weight
        pl.BlockSpec((1, heads, hidden), lambda i: (i, 0, 0)),    # per-layer att_src (row blocks)
        pl.BlockSpec((1, hidden, heads), lambda i: (i, 0, 0)),    # per-layer att_dst (col blocks)
        pl.BlockSpec((2, hidden), lambda i: (0, 0)),              # bn_hidden gamma/beta
        pl.BlockSpec((hidden, n_classes), lambda i: (0, 0)),      # lin_class weight
        pl.BlockSpec((1, n_classes), lambda i: (0, 0)),           # lin_class bias
    ]
    out_spec = pl.BlockSpec((num_graphs, n_classes), lambda i: (0, 0))

    op_bytes = sum(int(o.size) * o.dtype.itemsize for o in operands)
    vmem_limit = min(64 * 1024 * 1024, max(8 * 1024 * 1024, 8 * op_bytes))

    return pl.pallas_call(
        _make_kernel(heads, head_dim),
        out_shape=jax.ShapeDtypeStruct((num_graphs, n_classes), f32),
        grid_spec=pltpu.PrefetchScalarGridSpec(
            num_scalar_prefetch=0,
            grid=(num_convs,),
            in_specs=in_specs,
            out_specs=out_spec,
            scratch_shapes=[pltpu.VMEM((n_nodes, hidden), f32)],  # node features, persists across layers
        ),
        compiler_params=pltpu.CompilerParams(
            dimension_semantics=("arbitrary",),   # layer axis is sequential (state carried in scratch)
            vmem_limit_bytes=int(vmem_limit),
        ),
    )(*operands)


# pure-JAX reference (no Pallas) for a correctness cross-check
def gatnet_reference(x, adj, pool, params, heads):
    hidden = params["wgat"].shape[-1]
    head_dim = hidden // heads
    supp = adj > 0.0
    h = _stem(x, params["bnfeat"], params["wfeat"])
    for l in range(params["wgat"].shape[0]):
        slab = params["bnconv"][l]
        h = _gat_layer(h, adj, supp, params["wgat"][l],
                       params["attsrc"][l], params["attdst"][l],
                       slab[0:1, :], slab[1:2, :], slab[2:3, :],
                       heads, head_dim)
    return _readout(h, pool, params["bnh"], params["wc"], params["bc"])


if __name__ == "__main__":
    key = jax.random.PRNGKey(0)
    k_x, k_src, k_dst, k_param = jax.random.split(key, 4)

    N_NODES, N_GRAPHS = 16, 2
    F_IN, HIDDEN, N_CLASSES, HEADS = 4, 32, 3, 4
    N_EDGES = 32

    x = jax.random.normal(k_x, (N_NODES, F_IN), jnp.float32)
    edge_src = jax.random.randint(k_src, (N_EDGES,), 0, N_NODES)
    edge_dst = jax.random.randint(k_dst, (N_EDGES,), 0, N_NODES)
    batch = jnp.repeat(jnp.arange(N_GRAPHS), N_NODES // N_GRAPHS)  # node -> graph id

    params = init_params(k_param, F_IN, HIDDEN, N_CLASSES, heads=HEADS, num_convs=3)

    out = gatnet_forward(x, edge_src, edge_dst, batch, num_graphs=N_GRAPHS,
                         params=params, heads=HEADS)
    out = jax.block_until_ready(out)

    # cross-check against the pure-JAX reference (same dense formulation, no Pallas)
    adj = jnp.zeros((N_NODES, N_NODES), jnp.float32).at[edge_dst, edge_src].add(1.0)
    eye = jnp.eye(N_NODES, dtype=jnp.float32)
    adj = adj * (1.0 - eye) + eye
    pool = (batch[None, :] == jnp.arange(N_GRAPHS)[:, None]).astype(jnp.float32)
    ref = gatnet_reference(x, adj, pool, params, HEADS)

    assert out.shape == (N_GRAPHS, N_CLASSES)
    assert bool(jnp.all(jnp.isfinite(out)))
    assert bool(jnp.allclose(jnp.sum(jnp.exp(out), axis=-1), 1.0, atol=1e-5))
    assert bool(jnp.allclose(out, ref, atol=5e-3, rtol=5e-3))
    print("KERNEL_OK")
</pallas_src>

<mosaic_0001>
module attributes {stable_mosaic.version = 11 : i64} {
  func.func private @main(%arg0: i32) attributes {dimension_semantics = [#tpu.dimension_semantics<core_parallel>], iteration_bounds = array<i64: 2>, tpu.core_type = #tpu.core_type<sc_scalar_subcore>, window_params = []} {
    return
  }
}

module attributes {stable_mosaic.version = 11 : i64} {
  func.func private @main(%arg0: i32) attributes {dimension_semantics = [#tpu.dimension_semantics<core_parallel>], iteration_bounds = array<i64: 2>, tpu.core_type = #tpu.core_type<sc_scalar_subcore>, window_params = []} {
    return
  }
}

module attributes {stable_mosaic.version = 11 : i64} {
  func.func @kernel(%arg0: i32, %arg1: memref<16x4xf32, #tpu.memory_space<vmem>>, %arg2: memref<16x16xbf16, #tpu.memory_space<vmem>>, %arg3: memref<2x16xbf16, #tpu.memory_space<vmem>>, %arg4: memref<2x4xf32, #tpu.memory_space<vmem>>, %arg5: memref<4x32xf32, #tpu.memory_space<vmem>>, %arg6: memref<1x3x32xf32, #tpu.memory_space<vmem>>, %arg7: memref<1x32x32xf32, #tpu.memory_space<vmem>>, %arg8: memref<1x4x32xf32, #tpu.memory_space<vmem>>, %arg9: memref<1x32x4xf32, #tpu.memory_space<vmem>>, %arg10: memref<2x32xf32, #tpu.memory_space<vmem>>, %arg11: memref<32x3xf32, #tpu.memory_space<vmem>>, %arg12: memref<1x3xf32, #tpu.memory_space<vmem>>, %arg13: memref<2x3xf32, #tpu.memory_space<vmem>>, %arg14: memref<16x32xf32, #tpu.memory_space<vmem>>) attributes {dimension_semantics = [#tpu.dimension_semantics<arbitrary>], iteration_bounds = array<i64: 3>, scalar_prefetch = 0 : i64, scratch_operands = 1 : i64, tpu.core_type = #tpu.core_type<tc>, window_params = [{pipeline_mode = #tpu.pipeline_mode<synchronous>, transform_indices = @transform_0, window_bounds = array<i64: 16, 4>}, {pipeline_mode = #tpu.pipeline_mode<synchronous>, transform_indices = @transform_1, window_bounds = array<i64: 16, 16>}, {pipeline_mode = #tpu.pipeline_mode<synchronous>, transform_indices = @transform_2, window_bounds = array<i64: 2, 16>}, {pipeline_mode = #tpu.pipeline_mode<synchronous>, transform_indices = @transform_3, window_bounds = array<i64: 2, 4>}, {pipeline_mode = #tpu.pipeline_mode<synchronous>, transform_indices = @transform_4, window_bounds = array<i64: 4, 32>}, {transform_indices = @transform_5, window_bounds = array<i64: 1, 3, 32>}, {transform_indices = @transform_6, window_bounds = array<i64: 1, 32, 32>}, {transform_indices = @transform_7, window_bounds = array<i64: 1, 4, 32>}, {transform_indices = @transform_8, window_bounds = array<i64: 1, 32, 4>}, {pipeline_mode = #tpu.pipeline_mode<synchronous>, transform_indices = @transform_9, window_bounds = array<i64: 2, 32>}, {pipeline_mode = #tpu.pipeline_mode<synchronous>, transform_indices = @transform_10, window_bounds = array<i64: 32, 3>}, {pipeline_mode = #tpu.pipeline_mode<synchronous>, transform_indices = @transform_11, window_bounds = array<i64: 1, 3>}, {pipeline_mode = #tpu.pipeline_mode<synchronous>, transform_indices = @transform_12, window_bounds = array<i64: 2, 3>}]} {
    %c0_i32 = arith.constant 0 : i32
    %0 = arith.cmpi eq, %arg0, %c0_i32 : i32
    %1 = arith.extui %0 : i1 to i32
    %c0_i32_0 = arith.constant 0 : i32
    %2 = arith.cmpi ne, %1, %c0_i32_0 : i32
    scf.if %2 {
      %c0_52 = arith.constant 0 : index
      %c0_53 = arith.constant 0 : index
      %149 = vector.load %arg1[%c0_52, %c0_53] : memref<16x4xf32, #tpu.memory_space<vmem>>, vector<16x4xf32>
      %c0_54 = arith.constant 0 : index
      %c0_55 = arith.constant 0 : index
      %150 = vector.load %arg4[%c0_54, %c0_55] : memref<2x4xf32, #tpu.memory_space<vmem>>, vector<2x4xf32>
      %c0_56 = arith.constant 0 : index
      %c0_57 = arith.constant 0 : index
      %151 = vector.load %arg5[%c0_56, %c0_57] : memref<4x32xf32, #tpu.memory_space<vmem>>, vector<4x32xf32>
      %152 = vector.extract_strided_slice %150 {offsets = [0, 0], sizes = [1, 4], strides = [1, 1]} : vector<2x4xf32> to vector<1x4xf32>
      %153 = vector.extract_strided_slice %150 {offsets = [1, 0], sizes = [1, 4], strides = [1, 1]} : vector<2x4xf32> to vector<1x4xf32>
      %cst_58 = arith.constant dense<0.000000e+00> : vector<4xf32>
      %154 = vector.multi_reduction <add>, %149, %cst_58 [0] : vector<16x4xf32> to vector<4xf32>
      %155 = vector.shape_cast %154 : vector<4xf32> to vector<1x4xf32>
      %cst_59 = arith.constant 1.600000e+01 : f32
      %156 = vector.broadcast %cst_59 : f32 to vector<1x4xf32>
      %157 = arith.divf %155, %156 : vector<1x4xf32>
      %158 = vector.broadcast %157 : vector<1x4xf32> to vector<16x4xf32>
      %159 = arith.subf %149, %158 : vector<16x4xf32>
      %160 = arith.mulf %159, %159 : vector<16x4xf32>
      %cst_60 = arith.constant dense<0.000000e+00> : vector<4xf32>
      %161 = vector.multi_reduction <add>, %160, %cst_60 [0] : vector<16x4xf32> to vector<4xf32>
      %162 = vector.shape_cast %161 : vector<4xf32> to vector<1x4xf32>
      %cst_61 = arith.constant 1.600000e+01 : f32
      %163 = vector.broadcast %cst_61 : f32 to vector<1x4xf32>
      %164 = arith.divf %162, %163 : vector<1x4xf32>
      %165 = vector.broadcast %157 : vector<1x4xf32> to vector<16x4xf32>
      %166 = arith.subf %149, %165 : vector<16x4xf32>
      %cst_62 = arith.constant 9.99999974E-6 : f32
      %167 = vector.broadcast %cst_62 : f32 to vector<1x4xf32>
      %168 = arith.addf %164, %167 : vector<1x4xf32>
      %169 = math.rsqrt %168 : vector<1x4xf32>
      %170 = vector.broadcast %169 : vector<1x4xf32> to vector<16x4xf32>
      %171 = arith.mulf %166, %170 : vector<16x4xf32>
      %172 = vector.broadcast %152 : vector<1x4xf32> to vector<16x4xf32>
      %173 = arith.mulf %171, %172 : vector<16x4xf32>
      %174 = vector.broadcast %153 : vector<1x4xf32> to vector<16x4xf32>
      %175 = arith.addf %173, %174 : vector<16x4xf32>
      %cst_63 = arith.constant dense<0.000000e+00> : vector<16x32xf32>
      %176 = tpu.matmul %175, %151, %cst_63 {dimension_numbers = #tpu.dot_dimension_numbers<[1], [0], [0], [1], [0, 0, 1, 1], [], []>} : vector<16x4xf32>, vector<4x32xf32>, vector<16x32xf32> -> vector<16x32xf32>
      %cst_64 = arith.constant 0.000000e+00 : f32
      %177 = vector.broadcast %cst_64 : f32 to vector<16x32xf32>
      %178 = arith.maximumf %176, %177 : vector<16x32xf32>
      %c0_65 = arith.constant 0 : index
      %c0_66 = arith.constant 0 : index
      %179 = vector.load %arg14[%c0_65, %c0_66] : memref<16x32xf32, #tpu.memory_space<vmem>>, vector<16x32xf32>
      tpu.vector_store %arg14[%c0_65, %c0_66], %178 {strides = array<i32>} : memref<16x32xf32, #tpu.memory_space<vmem>>, vector<16x32xf32>,
    } else {
    }
    %c0 = arith.constant 0 : index
    %c0_1 = arith.constant 0 : index
    %3 = vector.load %arg2[%c0, %c0_1] : memref<16x16xbf16, #tpu.memory_space<vmem>>, vector<16x16xbf16>
    %4 = arith.extf %3 : vector<16x16xbf16> to vector<16x16xf32>
    %cst = arith.constant 0.000000e+00 : f32
    %5 = vector.broadcast %cst : f32 to vector<16x16xf32>
    %6 = arith.cmpf ogt, %4, %5 : vector<16x16xf32>
    %c0_2 = arith.constant 0 : index
    %c0_3 = arith.constant 0 : index
    %c0_4 = arith.constant 0 : index
    %7 = vector.load %arg6[%c0_2, %c0_3, %c0_4] : memref<1x3x32xf32, #tpu.memory_space<vmem>>, vector<1x3x32xf32>
    %8 = vector.shape_cast %7 : vector<1x3x32xf32> to vector<3x32xf32>
    %c0_5 = arith.constant 0 : index
    %c0_6 = arith.constant 0 : index
    %9 = vector.load %arg14[%c0_5, %c0_6] : memref<16x32xf32, #tpu.memory_space<vmem>>, vector<16x32xf32>
    %c0_7 = arith.constant 0 : index
    %c0_8 = arith.constant 0 : index
    %c0_9 = arith.constant 0 : index
    %10 = vector.load %arg7[%c0_7, %c0_8, %c0_9] : memref<1x32x32xf32, #tpu.memory_space<vmem>>, vector<1x32x32xf32>
    %11 = vector.shape_cast %10 : vector<1x32x32xf32> to vector<32x32xf32>
    %c0_10 = arith.constant 0 : index
    %c0_11 = arith.constant 0 : index
    %c0_12 = arith.constant 0 : index
    %12 = vector.load %arg8[%c0_10, %c0_11, %c0_12] : memref<1x4x32xf32, #tpu.memory_space<vmem>>, vector<1x4x32xf32>
    %13 = vector.shape_cast %12 : vector<1x4x32xf32> to vector<4x32xf32>
    %c0_13 = arith.constant 0 : index
    %c0_14 = arith.constant 0 : index
    %c0_15 = arith.constant 0 : index
    %14 = vector.load %arg9[%c0_13, %c0_14, %c0_15] : memref<1x32x4xf32, #tpu.memory_space<vmem>>, vector<1x32x4xf32>
    %15 = vector.shape_cast %14 : vector<1x32x4xf32> to vector<32x4xf32>
    %16 = vector.extract_strided_slice %8 {offsets = [0, 0], sizes = [1, 32], strides = [1, 1]} : vector<3x32xf32> to vector<1x32xf32>
    %17 = vector.extract_strided_slice %8 {offsets = [1, 0], sizes = [1, 32], strides = [1, 1]} : vector<3x32xf32> to vector<1x32xf32>
    %18 = vector.extract_strided_slice %8 {offsets = [2, 0], sizes = [1, 32], strides = [1, 1]} : vector<3x32xf32> to vector<1x32xf32>
    %cst_16 = arith.constant dense<0.000000e+00> : vector<32xf32>
    %19 = vector.multi_reduction <add>, %9, %cst_16 [0] : vector<16x32xf32> to vector<32xf32>
    %20 = vector.shape_cast %19 : vector<32xf32> to vector<1x32xf32>
    %cst_17 = arith.constant 1.600000e+01 : f32
    %21 = vector.broadcast %cst_17 : f32 to vector<1x32xf32>
    %22 = arith.divf %20, %21 : vector<1x32xf32>
    %23 = vector.broadcast %22 : vector<1x32xf32> to vector<16x32xf32>
    %24 = arith.subf %9, %23 : vector<16x32xf32>
    %25 = arith.mulf %24, %24 : vector<16x32xf32>
    %cst_18 = arith.constant dense<0.000000e+00> : vector<32xf32>
    %26 = vector.multi_reduction <add>, %25, %cst_18 [0] : vector<16x32xf32> to vector<32xf32>
    %27 = vector.shape_cast %26 : vector<32xf32> to vector<1x32xf32>
    %cst_19 = arith.constant 1.600000e+01 : f32
    %28 = vector.broadcast %cst_19 : f32 to vector<1x32xf32>
    %29 = arith.divf %27, %28 : vector<1x32xf32>
    %30 = vector.broadcast %22 : vector<1x32xf32> to vector<16x32xf32>
    %31 = arith.subf %9, %30 : vector<16x32xf32>
    %cst_20 = arith.constant 9.99999974E-6 : f32
    %32 = vector.broadcast %cst_20 : f32 to vector<1x32xf32>
    %33 = arith.addf %29, %32 : vector<1x32xf32>
    %34 = math.rsqrt %33 : vector<1x32xf32>
    %35 = vector.broadcast %34 : vector<1x32xf32> to vector<16x32xf32>
    %36 = arith.mulf %31, %35 : vector<16x32xf32>
    %37 = vector.broadcast %16 : vector<1x32xf32> to vector<16x32xf32>
    %38 = arith.mulf %36, %37 : vector<16x32xf32>
    %39 = vector.broadcast %17 : vector<1x32xf32> to vector<16x32xf32>
    %40 = arith.addf %38, %39 : vector<16x32xf32>
    %cst_21 = arith.constant dense<0.000000e+00> : vector<16x32xf32>
    %41 = tpu.matmul %40, %11, %cst_21 {dimension_numbers = #tpu.dot_dimension_numbers<[1], [0], [0], [1], [0, 0, 1, 1], [], []>} : vector<16x32xf32>, vector<32x32xf32>, vector<16x32xf32> -> vector<16x32xf32>
    %cst_22 = arith.constant dense<0.000000e+00> : vector<16x4xf32>
    %42 = tpu.matmul %41, %15, %cst_22 {dimension_numbers = #tpu.dot_dimension_numbers<[1], [0], [0], [1], [0, 0, 1, 1], [], []>} : vector<16x32xf32>, vector<32x4xf32>, vector<16x4xf32> -> vector<16x4xf32>
    "tpu.trace_start"() <{level = 10 : i32, message = "hk,nk->hn"}> : () -> ()
    %cst_23 = arith.constant dense<0.000000e+00> : vector<4x16xf32>
    %43 = tpu.matmul %13, %41, %cst_23 {dimension_numbers = #tpu.dot_dimension_numbers<[1], [1], [0], [0], [0, 0, 1, 0], [], []>} : vector<4x32xf32>, vector<16x32xf32>, vector<4x16xf32> -> vector<4x16xf32>
    "tpu.trace_stop"() : () -> ()
    %44 = vector.extract_strided_slice %42 {offsets = [0, 0], sizes = [16, 1], strides = [1, 1]} : vector<16x4xf32> to vector<16x1xf32>
    %45 = vector.extract_strided_slice %43 {offsets = [0, 0], sizes = [1, 16], strides = [1, 1]} : vector<4x16xf32> to vector<1x16xf32>
    %46 = vector.broadcast %44 : vector<16x1xf32> to vector<16x16xf32>
    %47 = vector.broadcast %45 : vector<1x16xf32> to vector<16x16xf32>
    %48 = arith.addf %46, %47 : vector<16x16xf32>
    %cst_24 = arith.constant 0.000000e+00 : f32
    %49 = vector.broadcast %cst_24 : f32 to vector<16x16xf32>
    %50 = arith.cmpf oge, %48, %49 : vector<16x16xf32>
    %cst_25 = arith.constant 2.000000e-01 : f32
    %51 = vector.broadcast %cst_25 : f32 to vector<16x16xf32>
    %52 = arith.mulf %51, %48 : vector<16x16xf32>
    %53 = arith.select %50, %48, %52 : vector<16x16xi1>, vector<16x16xf32>
    %cst_26 = arith.constant -1.000000e+30 : f32
    %54 = vector.broadcast %cst_26 : f32 to vector<16x16xf32>
    %55 = arith.select %6, %53, %54 : vector<16x16xi1>, vector<16x16xf32>
    %cst_27 = arith.constant dense<0xFF800000> : vector<16xf32>
    %56 = vector.multi_reduction <maximumf>, %55, %cst_27 [1] : vector<16x16xf32> to vector<16xf32>
    %57 = vector.shape_cast %56 : vector<16xf32> to vector<16x1xf32>
    %58 = vector.broadcast %57 : vector<16x1xf32> to vector<16x16xf32>
    %59 = arith.subf %55, %58 : vector<16x16xf32>
    %60 = math.exp %59 : vector<16x16xf32>
    %61 = arith.mulf %4, %60 : vector<16x16xf32>
    %cst_28 = arith.constant dense<0.000000e+00> : vector<16xf32>
    %62 = vector.multi_reduction <add>, %61, %cst_28 [1] : vector<16x16xf32> to vector<16xf32>
    %63 = vector.shape_cast %62 : vector<16xf32> to vector<16x1xf32>
    %64 = vector.broadcast %63 : vector<16x1xf32> to vector<16x16xf32>
    %65 = arith.divf %61, %64 : vector<16x16xf32>
    %66 = vector.extract_strided_slice %41 {offsets = [0, 0], sizes = [16, 8], strides = [1, 1]} : vector<16x32xf32> to vector<16x8xf32>
    %cst_29 = arith.constant dense<0.000000e+00> : vector<16x8xf32>
    %67 = tpu.matmul %65, %66, %cst_29 {dimension_numbers = #tpu.dot_dimension_numbers<[1], [0], [0], [1], [0, 0, 1, 1], [], []>} : vector<16x16xf32>, vector<16x8xf32>, vector<16x8xf32> -> vector<16x8xf32>
    %68 = vector.extract_strided_slice %42 {offsets = [0, 1], sizes = [16, 1], strides = [1, 1]} : vector<16x4xf32> to vector<16x1xf32>
    %69 = vector.extract_strided_slice %43 {offsets = [1, 0], sizes = [1, 16], strides = [1, 1]} : vector<4x16xf32> to vector<1x16xf32>
    %70 = vector.broadcast %68 : vector<16x1xf32> to vector<16x16xf32>
    %71 = vector.broadcast %69 : vector<1x16xf32> to vector<16x16xf32>
    %72 = arith.addf %70, %71 : vector<16x16xf32>
    %cst_30 = arith.constant 0.000000e+00 : f32
    %73 = vector.broadcast %cst_30 : f32 to vector<16x16xf32>
    %74 = arith.cmpf oge, %72, %73 : vector<16x16xf32>
    %cst_31 = arith.constant 2.000000e-01 : f32
    %75 = vector.broadcast %cst_31 : f32 to vector<16x16xf32>
    %76 = arith.mulf %75, %72 : vector<16x16xf32>
    %77 = arith.select %74, %72, %76 : vector<16x16xi1>, vector<16x16xf32>
    %cst_32 = arith.constant -1.000000e+30 : f32
    %78 = vector.broadcast %cst_32 : f32 to vector<16x16xf32>
    %79 = arith.select %6, %77, %78 : vector<16x16xi1>, vector<16x16xf32>
    %cst_33 = arith.constant dense<0xFF800000> : vector<16xf32>
    %80 = vector.multi_reduction <maximumf>, %79, %cst_33 [1] : vector<16x16xf32> to vector<16xf32>
    %81 = vector.shape_cast %80 : vector<16xf32> to vector<16x1xf32>
    %82 = vector.broadcast %81 : vector<16x1xf32> to vector<16x16xf32>
    %83 = arith.subf %79, %82 : vector<16x16xf32>
    %84 = math.exp %83 : vector<16x16xf32>
    %85 = arith.mulf %4, %84 : vector<16x16xf32>
    %cst_34 = arith.constant dense<0.000000e+00> : vector<16xf32>
    %86 = vector.multi_reduction <add>, %85, %cst_34 [1] : vector<16x16xf32> to vector<16xf32>
    %87 = vector.shape_cast %86 : vector<16xf32> to vector<16x1xf32>
    %88 = vector.broadcast %87 : vector<16x1xf32> to vector<16x16xf32>
    %89 = arith.divf %85, %88 : vector<16x16xf32>
    %90 = vector.extract_strided_slice %41 {offsets = [0, 8], sizes = [16, 8], strides = [1, 1]} : vector<16x32xf32> to vector<16x8xf32>
    %cst_35 = arith.constant dense<0.000000e+00> : vector<16x8xf32>
    %91 = tpu.matmul %89, %90, %cst_35 {dimension_numbers = #tpu.dot_dimension_numbers<[1], [0], [0], [1], [0, 0, 1, 1], [], []>} : vector<16x16xf32>, vector<16x8xf32>, vector<16x8xf32> -> vector<16x8xf32>
    %92 = vector.extract_strided_slice %42 {offsets = [0, 2], sizes = [16, 1], strides = [1, 1]} : vector<16x4xf32> to vector<16x1xf32>
    %93 = vector.extract_strided_slice %43 {offsets = [2, 0], sizes = [1, 16], strides = [1, 1]} : vector<4x16xf32> to vector<1x16xf32>
    %94 = vector.broadcast %92 : vector<16x1xf32> to vector<16x16xf32>
    %95 = vector.broadcast %93 : vector<1x16xf32> to vector<16x16xf32>
    %96 = arith.addf %94, %95 : vector<16x16xf32>
    %cst_36 = arith.constant 0.000000e+00 : f32
    %97 = vector.broadcast %cst_36 : f32 to vector<16x16xf32>
    %98 = arith.cmpf oge, %96, %97 : vector<16x16xf32>
    %cst_37 = arith.constant 2.000000e-01 : f32
    %99 = vector.broadcast %cst_37 : f32 to vector<16x16xf32>
    %100 = arith.mulf %99, %96 : vector<16x16xf32>
    %101 = arith.select %98, %96, %100 : vector<16x16xi1>, vector<16x16xf32>
    %cst_38 = arith.constant -1.000000e+30 : f32
    %102 = vector.broadcast %cst_38 : f32 to vector<16x16xf32>
    %103 = arith.select %6, %101, %102 : vector<16x16xi1>, vector<16x16xf32>
    %cst_39 = arith.constant dense<0xFF800000> : vector<16xf32>
    %104 = vector.multi_reduction <maximumf>, %103, %cst_39 [1] : vector<16x16xf32> to vector<16xf32>
    %105 = vector.shape_cast %104 : vector<16xf32> to vector<16x1xf32>
    %106 = vector.broadcast %105 : vector<16x1xf32> to vector<16x16xf32>
    %107 = arith.subf %103, %106 : vector<16x16xf32>
    %108 = math.exp %107 : vector<16x16xf32>
    %109 = arith.mulf %4, %108 : vector<16x16xf32>
    %cst_40 = arith.constant dense<0.000000e+00> : vector<16xf32>
    %110 = vector.multi_reduction <add>, %109, %cst_40 [1] : vector<16x16xf32> to vector<16xf32>
    %111 = vector.shape_cast %110 : vector<16xf32> to vector<16x1xf32>
    %112 = vector.broadcast %111 : vector<16x1xf32> to vector<16x16xf32>
    %113 = arith.divf %109, %112 : vector<16x16xf32>
    %114 = vector.extract_strided_slice %41 {offsets = [0, 16], sizes = [16, 8], strides = [1, 1]} : vector<16x32xf32> to vector<16x8xf32>
    %cst_41 = arith.constant dense<0.000000e+00> : vector<16x8xf32>
    %115 = tpu.matmul %113, %114, %cst_41 {dimension_numbers = #tpu.dot_dimension_numbers<[1], [0], [0], [1], [0, 0, 1, 1], [], []>} : vector<16x16xf32>, vector<16x8xf32>, vector<16x8xf32> -> vector<16x8xf32>
    %116 = vector.extract_strided_slice %42 {offsets = [0, 3], sizes = [16, 1], strides = [1, 1]} : vector<16x4xf32> to vector<16x1xf32>
    %117 = vector.extract_strided_slice %43 {offsets = [3, 0], sizes = [1, 16], strides = [1, 1]} : vector<4x16xf32> to vector<1x16xf32>
    %118 = vector.broadcast %116 : vector<16x1xf32> to vector<16x16xf32>
    %119 = vector.broadcast %117 : vector<1x16xf32> to vector<16x16xf32>
    %120 = arith.addf %118, %119 : vector<16x16xf32>
    %cst_42 = arith.constant 0.000000e+00 : f32
    %121 = vector.broadcast %cst_42 : f32 to vector<16x16xf32>
    %122 = arith.cmpf oge, %120, %121 : vector<16x16xf32>
    %cst_43 = arith.constant 2.000000e-01 : f32
    %123 = vector.broadcast %cst_43 : f32 to vector<16x16xf32>
    %124 = arith.mulf %123, %120 : vector<16x16xf32>
    %125 = arith.select %122, %120, %124 : vector<16x16xi1>, vector<16x16xf32>
    %cst_44 = arith.constant -1.000000e+30 : f32
    %126 = vector.broadcast %cst_44 : f32 to vector<16x16xf32>
    %127 = arith.select %6, %125, %126 : vector<16x16xi1>, vector<16x16xf32>
    %cst_45 = arith.constant dense<0xFF800000> : vector<16xf32>
    %128 = vector.multi_reduction <maximumf>, %127, %cst_45 [1] : vector<16x16xf32> to vector<16xf32>
    %129 = vector.shape_cast %128 : vector<16xf32> to vector<16x1xf32>
    %130 = vector.broadcast %129 : vector<16x1xf32> to vector<16x16xf32>
    %131 = arith.subf %127, %130 : vector<16x16xf32>
    %132 = math.exp %131 : vector<16x16xf32>
    %133 = arith.mulf %4, %132 : vector<16x16xf32>
    %cst_46 = arith.constant dense<0.000000e+00> : vector<16xf32>
    %134 = vector.multi_reduction <add>, %133, %cst_46 [1] : vector<16x16xf32> to vector<16xf32>
    %135 = vector.shape_cast %134 : vector<16xf32> to vector<16x1xf32>
    %136 = vector.broadcast %135 : vector<16x1xf32> to vector<16x16xf32>
    %137 = arith.divf %133, %136 : vector<16x16xf32>
    %138 = vector.extract_strided_slice %41 {offsets = [0, 24], sizes = [16, 8], strides = [1, 1]} : vector<16x32xf32> to vector<16x8xf32>
    %cst_47 = arith.constant dense<0.000000e+00> : vector<16x8xf32>
    %139 = tpu.matmul %137, %138, %cst_47 {dimension_numbers = #tpu.dot_dimension_numbers<[1], [0], [0], [1], [0, 0, 1, 1], [], []>} : vector<16x16xf32>, vector<16x8xf32>, vector<16x8xf32> -> vector<16x8xf32>
    %140 = tpu.concatenate %67, %91, %115, %139 in 1 : vector<16x8xf32>, vector<16x8xf32>, vector<16x8xf32>, vector<16x8xf32> -> vector<16x32xf32>
    %141 = vector.broadcast %18 : vector<1x32xf32> to vector<16x32xf32>
    %142 = arith.addf %140, %141 : vector<16x32xf32>
    %cst_48 = arith.constant 0.000000e+00 : f32
    %143 = vector.broadcast %cst_48 : f32 to vector<16x32xf32>
    %144 = arith.maximumf %142, %143 : vector<16x32xf32>
    %c0_49 = arith.constant 0 : index
    %c0_50 = arith.constant 0 : index
    %145 = vector.load %arg14[%c0_49, %c0_50] : memref<16x32xf32, #tpu.memory_space<vmem>>, vector<16x32xf32>
    tpu.vector_store %arg14[%c0_49, %c0_50], %144 {strides = array<i32>} : memref<16x32xf32, #tpu.memory_space<vmem>>, vector<16x32xf32>,
    %c2_i32 = arith.constant 2 : i32
    %146 = arith.cmpi eq, %arg0, %c2_i32 : i32
    %147 = arith.extui %146 : i1 to i32
    %c0_i32_51 = arith.constant 0 : i32
    %148 = arith.cmpi ne, %147, %c0_i32_51 : i32
    scf.if %148 {
      %c0_52 = arith.constant 0 : index
      %c0_53 = arith.constant 0 : index
      %149 = vector.load %arg14[%c0_52, %c0_53] : memref<16x32xf32, #tpu.memory_space<vmem>>, vector<16x32xf32>
      %c0_54 = arith.constant 0 : index
      %c0_55 = arith.constant 0 : index
      %150 = vector.load %arg3[%c0_54, %c0_55] : memref<2x16xbf16, #tpu.memory_space<vmem>>, vector<2x16xbf16>
      %151 = arith.extf %150 : vector<2x16xbf16> to vector<2x16xf32>
      %c0_56 = arith.constant 0 : index
      %c0_57 = arith.constant 0 : index
      %152 = vector.load %arg10[%c0_56, %c0_57] : memref<2x32xf32, #tpu.memory_space<vmem>>, vector<2x32xf32>
      %c0_58 = arith.constant 0 : index
      %c0_59 = arith.constant 0 : index
      %153 = vector.load %arg11[%c0_58, %c0_59] : memref<32x3xf32, #tpu.memory_space<vmem>>, vector<32x3xf32>
      %c0_60 = arith.constant 0 : index
      %c0_61 = arith.constant 0 : index
      %154 = vector.load %arg12[%c0_60, %c0_61] : memref<1x3xf32, #tpu.memory_space<vmem>>, vector<1x3xf32>
      %cst_62 = arith.constant dense<0.000000e+00> : vector<2x32xf32>
      %155 = tpu.matmul %151, %149, %cst_62 {dimension_numbers = #tpu.dot_dimension_numbers<[1], [0], [0], [1], [0, 0, 1, 1], [], []>} : vector<2x16xf32>, vector<16x32xf32>, vector<2x32xf32> -> vector<2x32xf32>
      %156 = vector.extract_strided_slice %152 {offsets = [0, 0], sizes = [1, 32], strides = [1, 1]} : vector<2x32xf32> to vector<1x32xf32>
      %157 = vector.extract_strided_slice %152 {offsets = [1, 0], sizes = [1, 32], strides = [1, 1]} : vector<2x32xf32> to vector<1x32xf32>
      %cst_63 = arith.constant dense<0.000000e+00> : vector<32xf32>
      %158 = vector.multi_reduction <add>, %155, %cst_63 [0] : vector<2x32xf32> to vector<32xf32>
      %159 = vector.shape_cast %158 : vector<32xf32> to vector<1x32xf32>
      %cst_64 = arith.constant 2.000000e+00 : f32
      %160 = vector.broadcast %cst_64 : f32 to vector<1x32xf32>
      %161 = arith.divf %159, %160 : vector<1x32xf32>
      %162 = vector.broadcast %161 : vector<1x32xf32> to vector<2x32xf32>
      %163 = arith.subf %155, %162 : vector<2x32xf32>
      %164 = arith.mulf %163, %163 : vector<2x32xf32>
      %cst_65 = arith.constant dense<0.000000e+00> : vector<32xf32>
      %165 = vector.multi_reduction <add>, %164, %cst_65 [0] : vector<2x32xf32> to vector<32xf32>
      %166 = vector.shape_cast %165 : vector<32xf32> to vector<1x32xf32>
      %cst_66 = arith.constant 2.000000e+00 : f32
      %167 = vector.broadcast %cst_66 : f32 to vector<1x32xf32>
      %168 = arith.divf %166, %167 : vector<1x32xf32>
      %169 = vector.broadcast %161 : vector<1x32xf32> to vector<2x32xf32>
      %170 = arith.subf %155, %169 : vector<2x32xf32>
      %cst_67 = arith.constant 9.99999974E-6 : f32
      %171 = vector.broadcast %cst_67 : f32 to vector<1x32xf32>
      %172 = arith.addf %168, %171 : vector<1x32xf32>
      %173 = math.rsqrt %172 : vector<1x32xf32>
      %174 = vector.broadcast %173 : vector<1x32xf32> to vector<2x32xf32>
      %175 = arith.mulf %170, %174 : vector<2x32xf32>
      %176 = vector.broadcast %156 : vector<1x32xf32> to vector<2x32xf32>
      %177 = arith.mulf %175, %176 : vector<2x32xf32>
      %178 = vector.broadcast %157 : vector<1x32xf32> to vector<2x32xf32>
      %179 = arith.addf %177, %178 : vector<2x32xf32>
      %cst_68 = arith.constant dense<0.000000e+00> : vector<2x3xf32>
      %180 = tpu.matmul %179, %153, %cst_68 {dimension_numbers = #tpu.dot_dimension_numbers<[1], [0], [0], [1], [0, 0, 1, 1], [], []>} : vector<2x32xf32>, vector<32x3xf32>, vector<2x3xf32> -> vector<2x3xf32>
      %181 = vector.broadcast %154 : vector<1x3xf32> to vector<2x3xf32>
      %182 = arith.addf %180, %181 : vector<2x3xf32>
      %cst_69 = arith.constant dense<0xFF800000> : vector<2xf32>
      %183 = vector.multi_reduction <maximumf>, %182, %cst_69 [1] : vector<2x3xf32> to vector<2xf32>
      %184 = vector.shape_cast %183 : vector<2xf32> to vector<2x1xf32>
      %185 = vector.broadcast %184 : vector<2x1xf32> to vector<2x3xf32>
      %186 = arith.subf %182, %185 : vector<2x3xf32>
      %187 = math.exp %186 : vector<2x3xf32>
      %cst_70 = arith.constant dense<0.000000e+00> : vector<2xf32>
      %188 = vector.multi_reduction <add>, %187, %cst_70 [1] : vector<2x3xf32> to vector<2xf32>
      %189 = vector.shape_cast %188 : vector<2xf32> to vector<2x1xf32>
      %190 = math.log %189 : vector<2x1xf32>
      %191 = arith.addf %190, %184 : vector<2x1xf32>
      %192 = vector.broadcast %191 : vector<2x1xf32> to vector<2x3xf32>
      %193 = arith.subf %182, %192 : vector<2x3xf32>
      %c0_71 = arith.constant 0 : index
      %c0_72 = arith.constant 0 : index
      %194 = vector.load %arg13[%c0_71, %c0_72] : memref<2x3xf32, #tpu.memory_space<vmem>>, vector<2x3xf32>
      tpu.vector_store %arg13[%c0_71, %c0_72], %193 {strides = array<i32>} : memref<2x3xf32, #tpu.memory_space<vmem>>, vector<2x3xf32>,
    } else {
    }
    return
  }
  func.func @transform_0(%arg0: i32) -> (i32, i32) {
    %c0_i32 = arith.constant 0 : i32
    %c0_i32_0 = arith.constant 0 : i32
    %c0_i32_1 = arith.constant 0 : i32
    return %c0_i32, %c0_i32_0 : i32, i32
  }
  func.func @transform_1(%arg0: i32) -> (i32, i32) {
    %c0_i32 = arith.constant 0 : i32
    %c0_i32_0 = arith.constant 0 : i32
    %c0_i32_1 = arith.constant 0 : i32
    return %c0_i32, %c0_i32_0 : i32, i32
  }
  func.func @transform_2(%arg0: i32) -> (i32, i32) {
    %c0_i32 = arith.constant 0 : i32
    %c0_i32_0 = arith.constant 0 : i32
    %c0_i32_1 = arith.constant 0 : i32
    return %c0_i32, %c0_i32_0 : i32, i32
  }
  func.func @transform_3(%arg0: i32) -> (i32, i32) {
    %c0_i32 = arith.constant 0 : i32
    %c0_i32_0 = arith.constant 0 : i32
    %c0_i32_1 = arith.constant 0 : i32
    return %c0_i32, %c0_i32_0 : i32, i32
  }
  func.func @transform_4(%arg0: i32) -> (i32, i32) {
    %c0_i32 = arith.constant 0 : i32
    %c0_i32_0 = arith.constant 0 : i32
    %c0_i32_1 = arith.constant 0 : i32
    return %c0_i32, %c0_i32_0 : i32, i32
  }
  func.func @transform_5(%arg0: i32) -> (i32, i32, i32) {
    %c0_i32 = arith.constant 0 : i32
    %c0_i32_0 = arith.constant 0 : i32
    %c0_i32_1 = arith.constant 0 : i32
    return %arg0, %c0_i32, %c0_i32_0 : i32, i32, i32
  }
  func.func @transform_6(%arg0: i32) -> (i32, i32, i32) {
    %c0_i32 = arith.constant 0 : i32
    %c0_i32_0 = arith.constant 0 : i32
    %c0_i32_1 = arith.constant 0 : i32
    return %arg0, %c0_i32, %c0_i32_0 : i32, i32, i32
  }
  func.func @transform_7(%arg0: i32) -> (i32, i32, i32) {
    %c0_i32 = arith.constant 0 : i32
    %c0_i32_0 = arith.constant 0 : i32
    %c0_i32_1 = arith.constant 0 : i32
    return %arg0, %c0_i32, %c0_i32_0 : i32, i32, i32
  }
  func.func @transform_8(%arg0: i32) -> (i32, i32, i32) {
    %c0_i32 = arith.constant 0 : i32
    %c0_i32_0 = arith.constant 0 : i32
    %c0_i32_1 = arith.constant 0 : i32
    return %arg0, %c0_i32, %c0_i32_0 : i32, i32, i32
  }
  func.func @transform_9(%arg0: i32) -> (i32, i32) {
    %c0_i32 = arith.constant 0 : i32
    %c0_i32_0 = arith.constant 0 : i32
    %c0_i32_1 = arith.constant 0 : i32
    return %c0_i32, %c0_i32_0 : i32, i32
  }
  func.func @transform_10(%arg0: i32) -> (i32, i32) {
    %c0_i32 = arith.constant 0 : i32
    %c0_i32_0 = arith.constant 0 : i32
    %c0_i32_1 = arith.constant 0 : i32
    return %c0_i32, %c0_i32_0 : i32, i32
  }
  func.func @transform_11(%arg0: i32) -> (i32, i32) {
    %c0_i32 = arith.constant 0 : i32
    %c0_i32_0 = arith.constant 0 : i32
    %c0_i32_1 = arith.constant 0 : i32
    return %c0_i32, %c0_i32_0 : i32, i32
  }
  func.func @transform_12(%arg0: i32) -> (i32, i32) {
    %c0_i32 = arith.constant 0 : i32
    %c0_i32_0 = arith.constant 0 : i32
    %c0_i32_1 = arith.constant 0 : i32
    return %c0_i32, %c0_i32_0 : i32, i32
  }
}

</mosaic_0001>

<bundles_post_ra>
// kernel: gatnet_forward.1
= control target key start
LH: loop header
LB: loop body
LE: loop exit
PB: predicated region body
PF: predicated region fallthrough
CT: control target
= control target key end

     0   :  { %17 = vsyncpa [#allocation4], 0  ;;  %s2181_s21 = smov 0   ;;  %s2413_s0 = inlined_call_operand.vmem [shape: f32[16,4], index: 0, kind: input, shape index: {}]   ;;  %s2414_s1 = inlined_call_operand.vmem [shape: bf16[16,16], index: 1, kind: input, shape index: {}]   ;;  %s2415_s2 = inlined_call_operand.vmem [shape: bf16[2,16], index: 2, kind: input, shape index: {}]   ;;  %s2416_s3 = inlined_call_operand.vmem [shape: f32[2,4], index: 3, kind: input, shape index: {}]   ;;  %s2417_s4 = inlined_call_operand.vmem [shape: f32[4,32], index: 4, kind: input, shape index: {}]   ;;  %s2418_s5 = inlined_call_operand.vmem [shape: f32[3,3,32], index: 5, kind: input, shape index: {}]   ;;  %s2419_s6 = inlined_call_operand.vmem [shape: f32[3,32,32], index: 6, kind: input, shape index: {}]   ;;  %s2420_s7 = inlined_call_operand.vmem [shape: f32[3,4,32], index: 7, kind: input, shape index: {}]   ;;  %s2421_s8 = inlined_call_operand.vmem [shape: f32[3,32,4], index: 8, kind: input, shape index: {}]   ;;  %s2422_s9 = inlined_call_operand.vmem [shape: f32[2,32], index: 9, kind: input, shape index: {}]   ;;  %s2423_s10 = inlined_call_operand.vmem [shape: f32[32,3], index: 10, kind: input, shape index: {}]   ;;  %s2424_s11 = inlined_call_operand.vmem [shape: f32[1,3], index: 11, kind: input, shape index: {}]   ;;  %s2425_s12 = inlined_call_operand.hbm [shape: f32[2,3], index: 12, kind: output, shape index: {}]  }
   0x1 LB: > { %s2187_s22 = sadd.s32 4294967295, %s2097_s21   ;;  %p1759_p0 = scmp.ge.s32.totalorder %s2097_s21, 1  ;;  %s2097_s21 = sphi %s2181_s21, %s23_s21  }
   0x2   : > { %p386_p1 = scmp.lt.s32.totalorder %s2097_s21, 4 }
   0x4   : > { %p387_p2 = pnand %p1759_p0, %p386_p1 }
   0x5   : > { %p436_p3 = scmp.lt.s32.totalorder (!%p387_p2), %s2187_s22, 2  ;;  %p1766_p4 = scmp.ne.s32.totalorder (!%p387_p2), %s2187_s22, 0 }
   0x6   : > { %390 = sbr.rel (%p387_p2) target bundleno = 2424 (0x978), region = 68 }
   0xd   : > { %s437_s23 = scalar_select %p436_p3, %s2187_s22, 2 }
   0xe   : > { %457 = sbr.rel (%p1766_p4) target bundleno = 290 (0x122), region = 72  ;;  %v461_v0 = vld [vmem:[%s2417_s4] sm:$0xf] (!%p1766_p4)  ;;  %vm510_vm0 = vcmask (!%p1766_p4), 1043456   ;;  %v459_v2 = vld [vmem:[%s2413_s0 + $0x8] sm:$0xff] (!%p1766_p4)  ;;  %vm462_vm1 = vcmask (!%p1766_p4), 31744   ;;  %v492_v27 = vlaneseq (!%p1766_p4) }
   0xf   : > { %s1760_s24 = sshll.u32 %s437_s23, 2  ;;  %s1793_s25 = sshll.u32 %s437_s23, 5  ;;  %v458_v1 = vld [vmem:[%s2413_s0] sm:$0xff] (!%p1766_p4)  ;;  %1841 = vmatprep.subr.msk.mxu0 (!%p1766_p4), %vm510_vm0, %v461_v0  ;;  %v464_v4 = vsel (!%p1766_p4), %vm462_vm1, %v459_v2, 0.0  ;;  %vm591_vm2 = vcmask (!%p1766_p4), 261120  }
  0x10   : > { %s2196_s28 = scalar_lea.vmem %s2418_s5, %s1760_s24  ;;  %s2201_s13 = scalar_lea.vmem %s2419_s6, %s1793_s25  ;;  %v463_v3 = vsel (!%p1766_p4), %vm462_vm1, %v458_v1, 0.0  ;;  %1842 = vmatpush3.msk.msra.mxu0 (!%p1766_p4), %vm510_vm0, %v461_v0  ;;  %v493_v29 = vshrl.u32 (!%p1766_p4), %v492_v27, 7  ;;  %v460_v31 = vld [vmem:[%s2416_s3] sm:$0x3] (!%p1766_p4) }
  0x11   : > { %s2206_s16 = scalar_lea.vmem %s2420_s7, %s1760_s24  ;;  %s2211_s19 = scalar_lea.vmem %s2421_s8, %s1793_s25  ;;  %v465_v5 = vadd.f32 (!%p1766_p4), %v464_v4, %v463_v3 }
  0x12   : > { %v494_v30 = vsub.s32 (!%p1766_p4), 0, %v493_v29  ;;  %v500_v32 = vsub.s32 (!%p1766_p4), 1, %v493_v29 }
  0x13   : > { %v466_v6 = vrot.slane (!%p1766_p4), %v465_v5, 4 }
  0x14   : > { %v495_v33 = vrot.slane (!%p1766_p4), %v460_v31, %v494_v30  ;;  %v501_v37 = vrot.slane (!%p1766_p4), %v460_v31, %v500_v32 }
  0x15   : > { %v467_v7 = vadd.f32 %v466_v6, %v465_v5 }
  0x17   : > { %v468_v8 = vrot.slane %v467_v7, 2 }
  0x19   : > { %v469_v9 = vadd.f32 %v468_v8, %v467_v7 }
  0x1b   : > { %v470_v10 = vrot.slane %v469_v9, 1 }
  0x1d   : > { %v471_v11 = vadd.f32 %v470_v10, %v469_v9 }
  0x1f   : > { %v473_v12 = vmul.f32 0.0625, %v471_v11 }
  0x21   : > { %v474_v13 = vsub.f32 %v458_v1, %v473_v12  ;;  %v475_v14 = vsub.f32 %v459_v2, %v473_v12 }
  0x23   : > { %v476_v15 = vmul.f32 %v474_v13, %v474_v13  ;;  %v477_v16 = vmul.f32 %v475_v14, %v475_v14 }
  0x25   : > { %v478_v17 = vsel %vm462_vm1, %v476_v15, 0.0  ;;  %v479_v18 = vsel %vm462_vm1, %v477_v16, 0.0 }
  0x26   : > { %v480_v19 = vadd.f32 %v479_v18, %v478_v17 }
  0x28   : > { %v481_v20 = vrot.slane %v480_v19, 4 }
  0x2a   : > { %v482_v21 = vadd.f32 %v481_v20, %v480_v19 }
  0x2c   : > { %v483_v22 = vrot.slane %v482_v21, 2 }
  0x2e   : > { %v484_v23 = vadd.f32 %v483_v22, %v482_v21 }
  0x30   : > { %v485_v24 = vrot.slane %v484_v23, 1 }
  0x32   : > { %v486_v25 = vadd.f32 %v485_v24, %v484_v23 }
  0x34   : > { %v487_v26 = vmul.f32 0.0625, %v486_v25 }
  0x36   : > { %v488_v28 = vadd.f32 1e-05, %v487_v26 }
  0x38   : > { %1997 = vrsqrt.f32 %v488_v28 }
  0x42   : > { %v1998_v34 = vpop.eup %1997 }
  0x43   : > { %v490_v35 = vmul.f32 %v1998_v34, %v474_v13  ;;  %v491_v36 = vmul.f32 %v1998_v34, %v475_v14 }
  0x45   : > { %v496_v38 = vmul.f32 %v495_v33, %v490_v35  ;;  %v497_v39 = vmul.f32 %v495_v33, %v491_v36 }
  0x47   : > { %v502_v40 = vadd.f32 %v501_v37, %v496_v38  ;;  %v503_v41 = vadd.f32 %v501_v37, %v497_v39 }
  0x49   : > { %1843 = vmatprep.mubr.msk.f32.mxu0 %vm462_vm1, %v502_v40 }
  0x4a   : > { %1844 = vmatmul.mubr.msk.f32.vlgmr.msra.gmra.mrb[0].mxu0 %vm462_vm1, %v503_v41 }
 0x11d   : > { %v1845_v42 = vpop.f32.mrb[0].mxu0 }
 0x11e   : > { %v590_v43 = vmax.f32 %v1845_v42, 0.0  ;;  %v580_v44 = vpop.f32.mrb[1].mxu0 }
 0x11f   : > { %v589_v45 = vmax.f32 %v580_v44, 0.0 }
 0x120   : > { %593 = vst.msk [vmem:[#allocation2 + $0x8] sm:$0xff] %vm591_vm2, %v590_v43 }
 0x121   : > { %592 = vst.msk [vmem:[#allocation2] sm:$0xff] %vm591_vm2, %v589_v45 }
 0x122 PF: > { %v603_v46 = vld [vmem:[%s2201_s13] sm:$0xff]  ;;  %v604_v47 = vld [vmem:[%s2201_s13 + $0x8] sm:$0xff]  ;;  %v605_v48 = vld [vmem:[%s2201_s13 + $0x10] sm:$0xff]  ;;  %vm612_vm3 = vcmask 261120   ;;  %v642_v20 = vlaneseq  ;;  %v2099_v35 = vmov 0.0|0.0   ;;  %vm2100_vm4 = vmmov 0  }
 0x123   : > { %v1921_v49 = vpack.c.bf16 %v604_v47, %v603_v46  ;;  %v606_v50 = vld [vmem:[%s2201_s13 + $0x18] sm:$0xff]  ;;  %v608_v55 = vld [vmem:[%s2211_s19] sm:$0xff]  ;;  %v609_v56 = vld [vmem:[%s2211_s19 + $0x8] sm:$0xff]  ;;  %v2101_v36 = vmov 0.0   ;;  %v2102_v37 = vmov 1   ;;  %v2103_v38 = vmov 0  }
 0x124   : > { %v1925_v52 = vpack.c.bf16 %v606_v50, %v605_v48  ;;  %v1929_v58 = vpack.c.bf16 %v609_v56, %v608_v55  ;;  %v610_v59 = vld [vmem:[%s2211_s19 + $0x10] sm:$0xff]  ;;  %v611_v60 = vld [vmem:[%s2211_s19 + $0x18] sm:$0xff]  ;;  %v2244_v22 = vshrl.u32 %v642_v20, 7  ;;  %v2250_v24 = vld [vmem:[%s2196_s28] sm:$0x7]  ;;  %2000 = vset.pattern.permute.xlu1 %v2102_v37  ;;  %1999 = vset.pattern.permute.xlu0 %v2103_v38  ;;  %v2104_v46 = vmov 2  }
 0x125   : > { %1922 = vmatprep.subr.bf16.mxu0 %v1921_v49  ;;  %v1933_v62 = vpack.c.bf16 %v611_v60, %v610_v59  ;;  %vm1939_vm5 = vmpackc.low %vm612_vm3, %vm612_vm3  ;;  %v607_v43 = vld [vmem:[%s2206_s16] sm:$0xf]  ;;  %vm913_vm9 = vcmask 130048   ;;  %s2106_s14 = smov 120   ;;  %s2107_s15 = smov 104   ;;  %vm1442_vm1 = vcmask 64512  }
 0x126   : > { %1924 = vmatpush3.bf16.msra.mxu0 %v1921_v49  ;;  %1930 = vmatprep.subr.bf16.mxu1 %v1929_v58  ;;  %v2247_v23 = vsub.s32 0, %v2244_v22  ;;  %v2253_v25 = vsub.s32 1, %v2244_v22  ;;  %v2105_v49 = vmov 3   ;;  %v1796_v50 = vld [vmem:[%s2414_s1] sm:$0xff]   ;;  %s2108_s16 = smov 112   ;;  %s2109_s17 = smov 16  }
 0x127   : > { %v602_v53 = vld [vmem:[#allocation2 + $0x8] sm:$0xff]  ;;  %1926 = vmatprep.subr.bf16.mxu0 %v1925_v52  ;;  %1932 = vmatpush3.bf16.msra.mxu1 %v1929_v58  ;;  %v2280_v60 = vunpack.c.l.bf16 %v1796_v50  ;;  %s2110_s18 = smov 8   ;;  %s2111_s19 = smov 24   ;;  %vm1447_vm2 = vcmask 195584  }
 0x128   : > { %v601_v51 = vld [vmem:[#allocation2] sm:$0xff]  ;;  %v614_v57 = vsel %vm612_vm3, %v602_v53, 0.0  ;;  %1934 = vmatprep.subr.bf16.mxu1 %v1933_v62  ;;  %v645_v26 = vrot.slane %v2250_v24, %v2247_v23  ;;  %v651_v30 = vrot.slane %v2250_v24, %v2253_v25  ;;  %p1785_p5 = scmp.ne.s32.totalorder %s2187_s22, 2 }
 0x129   : > { %v613_v54 = vsel %vm612_vm3, %v601_v51, 0.0  ;;  %vm598_vm10 = vcmp.gt.f32.partialorder %v2280_v60, 0.0 }
 0x12a   : > { %v615_v61 = vadd.f32 %v614_v57, %v613_v54  ;;  %1928 = vmatpush3.bf16.msra.mxu0 %v1925_v52  ;;  %v2275_v54 = vunpack.c.h.bf16 %v1796_v50 }
 0x12b   : > { %1936 = vmatpush3.bf16.msra.mxu1 %v1933_v62  ;;  %1937 = vmatprep.subr.bf16.mxu0 %v2099_v35 }
 0x12c   : > { %v616_v63 = vrot.slane %v615_v61, 4  ;;  %vm599_vm6 = vcmp.gt.f32.partialorder %v2275_v54, 0.0 }
 0x12e   : > { %v617_v0 = vadd.f32 %v616_v63, %v615_v61 }
 0x130   : > { %v618_v1 = vrot.slane %v617_v0, 2 }
 0x132   : > { %v619_v2 = vadd.f32 %v618_v1, %v617_v0 }
 0x134   : > { %v620_v3 = vrot.slane %v619_v2, 1 }
 0x136   : > { %v621_v4 = vadd.f32 %v620_v3, %v619_v2 }
 0x138   : > { %v623_v5 = vmul.f32 0.0625, %v621_v4 }
 0x13a   : > { %v624_v6 = vsub.f32 %v601_v51, %v623_v5  ;;  %v625_v7 = vsub.f32 %v602_v53, %v623_v5  ;;  %v1162_v53 = vsub.s32 2, %v2244_v22 }
 0x13c   : > { %v626_v8 = vmul.f32 %v624_v6, %v624_v6  ;;  %v627_v9 = vmul.f32 %v625_v7, %v625_v7 }
 0x13e   : > { %v628_v10 = vsel %vm612_vm3, %v626_v8, 0.0  ;;  %v629_v11 = vsel %vm612_vm3, %v627_v9, 0.0 }
 0x13f   : > { %v630_v12 = vadd.f32 %v629_v11, %v628_v10 }
 0x141   : > { %v631_v13 = vrot.slane %v630_v12, 4 }
 0x143   : > { %v632_v14 = vadd.f32 %v631_v13, %v630_v12  ;;  %v1295_v12 = vsub.s32 3, %v2244_v22 }
 0x145   : > { %v633_v15 = vrot.slane %v632_v14, 2 }
 0x147   : > { %v634_v16 = vadd.f32 %v633_v15, %v632_v14 }
 0x149   : > { %v635_v17 = vrot.slane %v634_v16, 1 }
 0x14b   : > { %v636_v18 = vadd.f32 %v635_v17, %v634_v16 }
 0x14d   : > { %v637_v19 = vmul.f32 0.0625, %v636_v18 }
 0x14f   : > { %v638_v21 = vadd.f32 1e-05, %v637_v19 }
 0x151   : > { %2021 = vrsqrt.f32 %v638_v21 }
 0x15b   : > { %v2022_v27 = vpop.eup %2021 }
 0x15c   : > { %v640_v28 = vmul.f32 %v2022_v27, %v624_v6  ;;  %v641_v29 = vmul.f32 %v2022_v27, %v625_v7 }
 0x15e   : > { %v646_v31 = vmul.f32 %v645_v26, %v640_v28  ;;  %v647_v32 = vmul.f32 %v645_v26, %v641_v29 }
 0x160   : > { %v652_v33 = vadd.f32 %v651_v30, %v646_v31  ;;  %v653_v34 = vadd.f32 %v651_v30, %v647_v32 }
 0x162   : > { %1854 = vmatprep.mubr.msk.f32.mxu0 %vm612_vm3, %v652_v33 }
 0x163   : > { %1855 = vmatmul.mubr.msk.f32.vlgmr.msra.gmra.mrb[0].mxu0 %vm612_vm3, %v653_v34 }
 0x164   : > { %1872 = vmatprep.mubr.msk.f32.mxu0 %vm2100_vm4, %v2101_v36  ;;  %vm2113_vm4 = vmmov (!%p1785_p5), 0  }
 0x236   : > { %v1856_v39 = vpop.f32.mrb[0].mxu0 }
 0x237   : > { %v726_v40 = vpop.f32.mrb[1].mxu0 }
 0x238   : > { %v1938_v41 = vpack.c.bf16 %v1856_v39, %v726_v40  ;;  %1865 = vmatprep.mubr.msk.f32.mxu1 %vm612_vm3, %v726_v40  ;;  %v2264_v42 = vpack.i.bf16 %v1856_v39, %v726_v40 }
 0x239   : > { %1866 = vmatmul.mubr.msk.f32.vlgmr.msra.gmra.mrb[0].mxu1 %vm612_vm3, %v1856_v39 }
 0x23a   : > { %1940 = vmatpush3.bf16.xpose.msk.msra.mxu0 %vm1939_vm5, %v1938_v41  ;;  %1942 = vmatprep.subr.bf16.mxu1 %v1938_v41  ;;  %vm1547_vm5 = vcmask (!%p1785_p5), 254976  }
 0x23b   : > { %1944 = vmatpush3.bf16.msra.mxu1 %v1938_v41 }
 0x241   : > { %1873 = vmatmul.mubr.msk.f32.vlgmr.msra.gmra.mrb[2].mxu0 %vm612_vm3, %v607_v43 }
 0x30c   : > { %v1867_v44 = vpop.f32.mrb[0].mxu1 }
 0x30d   : > { %1024 = vperm.xlu1 %2000, %v1867_v44   ;;  %896 = vperm.xlu0 %1999, %v1867_v44   ;;  %v807_v45 = vpop.f32.mrb[1].mxu1 }
 0x311   : > { %2001 = vset.pattern.permute.xlu1 %v2104_v46  ;;  %891 = vperm.xlu0 %1999, %v807_v45  }
 0x312   : > { %1157 = vperm.xlu1 %2001, %v1867_v44  }
 0x314   : > { %v885_v47 = vpop.f32.mrb[2].mxu0 }
 0x315   : > { %2003 = vset.pattern.permute.xlu0 %v2104_v46  ;;  %v1874_v48 = vpop.f32.mrb[3].mxu0  ;;  %v1030_v51 = vrot.slane %v885_v47, %v2253_v25  ;;  %v902_v52 = vrot.slane %v885_v47, %v2247_v23  ;;  %v1163_v59 = vrot.slane %v885_v47, %v1162_v53  ;;  %v1296_v27 = vrot.slane %v885_v47, %v1295_v12 }
 0x316   : > { %2002 = vset.pattern.permute.xlu1 %v2102_v37  ;;  %1153 = vperm.xlu0 %2003, %v807_v45  }
 0x317   : > { %1020 = vperm.xlu1 %2002, %v807_v45  }
 0x31a   : > { %2005 = vset.pattern.permute.xlu0 %v2105_v49 }
 0x31b   : > { %2004 = vset.pattern.permute.xlu1 %v2105_v49  ;;  %1290 = vperm.xlu0 %2005, %v1867_v44  }
 0x31c   : > { %1286 = vperm.xlu1 %2004, %v807_v45  }
 0x38c   : > { %v1025_v55 = vpop.permute.xlu1 %1024  ;;  %v897_v56 = vpop.permute.xlu0 %896 }
 0x38d   : > { %v1032_v57 = vadd.f32 %v1030_v51, %v1025_v55  ;;  %v904_v58 = vadd.f32 %v902_v52, %v897_v56 }
 0x38f   : > { %v1036_v61 = vmul.f32 0.2, %v1032_v57  ;;  %v908_v62 = vmul.f32 0.2, %v904_v58  ;;  %vm906_vm7 = vcmp.ge.f32.partialorder %v904_v58, 0.0  ;;  %vm1034_vm8 = vcmp.ge.f32.partialorder %v1032_v57, 0.0 }
 0x390   : > { %v892_v63 = vpop.permute.xlu0 %891 }
 0x391   : > { %v903_v0 = vadd.f32 %v902_v52, %v892_v63  ;;  %v1158_v1 = vpop.permute.xlu1 %1157  ;;  %v910_v2 = vsel %vm906_vm7, %v904_v58, %v908_v62  ;;  %v1038_v3 = vsel %vm1034_vm8, %v1032_v57, %v1036_v61 }
 0x392   : > { %v1165_v4 = vadd.f32 %v1163_v59, %v1158_v1  ;;  %v912_v5 = vsel %vm599_vm6, %v910_v2, -1e+30  ;;  %v1040_v9 = vsel %vm599_vm6, %v1038_v3, -1e+30 }
 0x393   : > { %v907_v6 = vmul.f32 0.2, %v903_v0  ;;  %v917_v7 = vsel %vm913_vm9, %v912_v5, -inf  ;;  %vm905_vm11 = vcmp.ge.f32.partialorder %v903_v0, 0.0  ;;  %v1044_v18 = vsel %vm913_vm9, %v1040_v9, -inf }
 0x394   : > { %v1169_v8 = vmul.f32 0.2, %v1165_v4  ;;  %918 = vmax.xlane.f32.xlu0 %v917_v7  ;;  %vm1167_vm12 = vcmp.ge.f32.partialorder %v1165_v4, 0.0 }
 0x395   : > { %v1154_v10 = vpop.permute.xlu0 %1153  ;;  %v909_v11 = vsel %vm905_vm11, %v903_v0, %v907_v6 }
 0x396   : > { %v1164_v13 = vadd.f32 %v1163_v59, %v1154_v10  ;;  %v1021_v14 = vpop.permute.xlu1 %1020  ;;  %v911_v15 = vsel %vm598_vm10, %v909_v11, -1e+30  ;;  %v1171_v16 = vsel %vm1167_vm12, %v1165_v4, %v1169_v8 }
 0x397   : > { %v1031_v17 = vadd.f32 %v1030_v51, %v1021_v14  ;;  %v914_v19 = vsel %vm913_vm9, %v911_v15, -inf  ;;  %v1173_v21 = vsel %vm599_vm6, %v1171_v16, -1e+30 }
 0x398   : > { %v1168_v20 = vmul.f32 0.2, %v1164_v13  ;;  %1045 = vmax.xlane.f32.xlu0 %v1044_v18  ;;  %915 = vmax.xlane.f32.xlu1 %v914_v19  ;;  %vm1166_vm13 = vcmp.ge.f32.partialorder %v1164_v13, 0.0  ;;  %v1177_v31 = vsel %vm913_vm9, %v1173_v21, -inf }
 0x399   : > { %v1035_v26 = vmul.f32 0.2, %v1031_v17  ;;  %vm1033_vm14 = vcmp.ge.f32.partialorder %v1031_v17, 0.0 }
 0x39a   : > { %v1291_v28 = vpop.permute.xlu0 %1290  ;;  %v1170_v33 = vsel %vm1166_vm13, %v1164_v13, %v1168_v20 }
 0x39b   : > { %v1298_v29 = vadd.f32 %v1296_v27, %v1291_v28  ;;  %v1287_v30 = vpop.permute.xlu1 %1286  ;;  %v1037_v32 = vsel %vm1033_vm14, %v1031_v17, %v1035_v26  ;;  %v1172_v39 = vsel %vm598_vm10, %v1170_v33, -1e+30 }
 0x39c   : > { %v1297_v34 = vadd.f32 %v1296_v27, %v1287_v30  ;;  %1178 = vmax.xlane.f32.xlu0 %v1177_v31  ;;  %v1039_v35 = vsel %vm598_vm10, %v1037_v32, -1e+30  ;;  %v1174_v45 = vsel %vm913_vm9, %v1172_v39, -inf }
 0x39d   : > { %v1302_v36 = vmul.f32 0.2, %v1298_v29  ;;  %v1041_v37 = vsel %vm913_vm9, %v1039_v35, -inf  ;;  %vm1300_vm15 = vcmp.ge.f32.partialorder %v1298_v29, 0.0 }
 0x39e   : > { %v1301_v38 = vmul.f32 0.2, %v1297_v34  ;;  %1042 = vmax.xlane.f32.xlu1 %v1041_v37  ;;  %vm1299_vm0 = vcmp.ge.f32.partialorder %v1297_v34, 0.0 }
 0x39f   : > { %v1304_v40 = vsel %vm1300_vm15, %v1298_v29, %v1302_v36 }
 0x3a0   : > { %v1306_v41 = vsel %vm599_vm6, %v1304_v40, -1e+30  ;;  %v1303_v43 = vsel %vm1299_vm0, %v1297_v34, %v1301_v38  ;;  %vm1659_vm6 = vcmask (!%p1785_p5), 17408  }
 0x3a1   : > { %v1310_v44 = vsel %vm913_vm9, %v1306_v41, -inf  ;;  %v1305_v46 = vsel %vm598_vm10, %v1303_v43, -1e+30 }
 0x3a2   : > { %1311 = vmax.xlane.f32.xlu0 %v1310_v44  ;;  %1175 = vmax.xlane.f32.xlu1 %v1174_v45  ;;  %v1307_v47 = vsel %vm913_vm9, %v1305_v46, -inf }
 0x3a6   : > { %1308 = vmax.xlane.f32.xlu1 %v1307_v47 }
 0x3b7   : > { %2007 = vrot.lane.b32.xlu1 %v2264_v42, %s2106_s14 }
 0x421   : > { %v919_v48 = vpop.xlane.xlu0 %918 }
 0x422   : > { %v921_v49 = vsub.f32 %v912_v5, %v919_v48 }
 0x424   : > { %v924_v50 = vmul.f32 1.442695, %v921_v49 }
 0x425   : > { %v1046_v51 = vpop.xlane.xlu0 %1045  ;;  %v916_v52 = vpop.xlane.xlu1 %915 }
 0x426   : > { %2023 = vpow2.f32 %v924_v50  ;;  %v1048_v55 = vsub.f32 %v1040_v9, %v1046_v51  ;;  %v920_v56 = vsub.f32 %v911_v15, %v916_v52 }
 0x428   : > { %v1051_v57 = vmul.f32 1.442695, %v1048_v55  ;;  %v922_v58 = vmul.f32 1.442695, %v920_v56 }
 0x429   : > { %v1179_v59 = vpop.xlane.xlu0 %1178 }
 0x42a   : > { %2025 = vpow2.f32 %v1051_v57  ;;  %v1181_v61 = vsub.f32 %v1173_v21, %v1179_v59 }
 0x42b   : > { %2027 = vpow2.f32 %v922_v58  ;;  %v1043_v62 = vpop.xlane.xlu1 %1042 }
 0x42c   : > { %v1184_v63 = vmul.f32 1.442695, %v1181_v61  ;;  %v1047_v0 = vsub.f32 %v1039_v35, %v1043_v62 }
 0x42e   : > { %2029 = vpow2.f32 %v1184_v63  ;;  %v1049_v1 = vmul.f32 1.442695, %v1047_v0 }
 0x42f   : > { %v1312_v2 = vpop.xlane.xlu0 %1311  ;;  %v1176_v3 = vpop.xlane.xlu1 %1175 }
 0x430   : > { %v2024_v4 = vpop.eup %2023  ;;  %2031 = vpow2.f32 %v1049_v1  ;;  %v1314_v5 = vsub.f32 %v1306_v41, %v1312_v2  ;;  %v1180_v6 = vsub.f32 %v1172_v39, %v1176_v3 }
 0x431   : > { %v2310_v7 = vmul.f32 %v2024_v4, %v2275_v54 }
 0x432   : > { %v1317_v8 = vmul.f32 1.442695, %v1314_v5  ;;  %v1182_v9 = vmul.f32 1.442695, %v1180_v6 }
 0x433   : > { %v1309_v10 = vpop.xlane.xlu1 %1308  ;;  %v931_v11 = vsel %vm913_vm9, %v2310_v7, 0.0 }
 0x434   : > { %v2026_v12 = vpop.eup %2025  ;;  %2033 = vpow2.f32 %v1317_v8  ;;  %v1313_v13 = vsub.f32 %v1305_v46, %v1309_v10  ;;  %932 = vadd.xlane.f32.xlu0 %v931_v11 }
 0x435   : > { %v2028_v14 = vpop.eup %2027  ;;  %2035 = vpow2.f32 %v1182_v9  ;;  %v2315_v15 = vmul.f32 %v2026_v12, %v2275_v54 }
 0x436   : > { %v1315_v16 = vmul.f32 1.442695, %v1313_v13  ;;  %v926_v17 = vmul.f32 %v2028_v14, %v2280_v60 }
 0x437   : > { %v2008_v18 = vpop.permute.xlu1 %2007  ;;  %v1058_v19 = vsel %vm913_vm9, %v2315_v15, 0.0 }
 0x438   : > { %v2030_v20 = vpop.eup %2029  ;;  %2037 = vpow2.f32 %v1315_v16  ;;  %v2010_v21 = vunpack.i.h.bf16 %v2008_v18  ;;  %v2009_v26 = vunpack.i.l.bf16 %v2008_v18  ;;  %1059 = vadd.xlane.f32.xlu0 %v1058_v19  ;;  %v928_v27 = vsel %vm913_vm9, %v926_v17, 0.0 }
 0x439   : > { %929 = vadd.xlane.f32.xlu1 %v928_v27  ;;  %v2322_v28 = vmul.f32 %v2030_v20, %v2275_v54 }
 0x43a   : > { %v2032_v29 = vpop.eup %2031  ;;  %v1945_v30 = vpack.c.bf16 %v2010_v21, %v2009_v26 }
 0x43b   : > { %v1191_v31 = vsel %vm913_vm9, %v2322_v28, 0.0  ;;  %v1053_v32 = vmul.f32 %v2032_v29, %v2280_v60 }
 0x43c   : > { %1192 = vadd.xlane.f32.xlu0 %v1191_v31  ;;  %1946 = vmatprep.subr.bf16.mxu1 %v1945_v30 }
 0x43d   : > { %v1055_v33 = vsel %vm913_vm9, %v1053_v32, 0.0 }
 0x43e   : > { %v2034_v34 = vpop.eup %2033  ;;  %1056 = vadd.xlane.f32.xlu1 %v1055_v33 }
 0x43f   : > { %v2036_v35 = vpop.eup %2035  ;;  %v2329_v36 = vmul.f32 %v2034_v34, %v2275_v54 }
 0x440   : > { %v1186_v37 = vmul.f32 %v2036_v35, %v2280_v60 }
 0x441   : > { %v1324_v38 = vsel %vm913_vm9, %v2329_v36, 0.0 }
 0x442   : > { %v2038_v39 = vpop.eup %2037  ;;  %1325 = vadd.xlane.f32.xlu0 %v1324_v38  ;;  %v1188_v40 = vsel %vm913_vm9, %v1186_v37, 0.0 }
 0x443   : > { %1189 = vadd.xlane.f32.xlu1 %v1188_v40  ;;  %v1319_v41 = vmul.f32 %v2038_v39, %v2280_v60 }
 0x445   : > { %v1321_v43 = vsel %vm913_vm9, %v1319_v41, 0.0 }
 0x447   : > { %1322 = vadd.xlane.f32.xlu1 %v1321_v43  ;;  %v2114_v43 = vmov (!%p1785_p5), 0.0  }
 0x458   : > { %2017 = vrot.lane.b32.xlu1 %v2264_v42, %s2107_s15  ;;  %2012 = vrot.lane.b32.xlu0 %v2264_v42, %s2108_s16 }
 0x4c1   : > { %v933_v54 = vpop.xlane.xlu0 %932 }
 0x4c2   : > { %2039 = vrcp.f32 %v933_v54  ;;  %v1466_v54 = vld [vmem:[%s2415_s2] sm:$0x1] (!%p1785_p5) }
 0x4c5   : > { %v1060_v44 = vpop.xlane.xlu0 %1059 }
 0x4c6   : > { %v930_v45 = vpop.xlane.xlu1 %929 }
 0x4c7   : > { %2041 = vrcp.f32 %v930_v45  ;;  %v1469_v45 = vld [vmem:[%s2423_s10] sm:$0xff] (!%p1785_p5) }
 0x4c8   : > { %2043 = vrcp.f32 %v1060_v44  ;;  %v1467_v44 = vunpack.c.l.bf16 (!%p1785_p5), %v1466_v54 }
 0x4c9   : > { %v1193_v46 = vpop.xlane.xlu0 %1192 }
 0x4cb   : > { %v1057_v47 = vpop.xlane.xlu1 %1056 }
 0x4cc   : > { %2045 = vrcp.f32 %v1057_v47  ;;  %v2040_v60 = vpop.eup %2039 }
 0x4cd   : > { %2047 = vrcp.f32 %v1193_v46  ;;  %v937_v52 = vmul.f32 %v2040_v60, %v2310_v7  ;;  %v1470_v46 = vld [vmem:[%s2423_s10 + $0x8] sm:$0xff] (!%p1785_p5)  ;;  %v1472_v60 = vld [vmem:[%s2423_s10 + $0x18] sm:$0xff] (!%p1785_p5) }
 0x4ce   : > { %v1961_v47 = vpack.c.bf16 (!%p1785_p5), %v1470_v46, %v1469_v45 }
 0x4cf   : > { %v1326_v48 = vpop.xlane.xlu0 %1325 }
 0x4d0   : > { %v1190_v49 = vpop.xlane.xlu1 %1189 }
 0x4d1   : > { %v2042_v50 = vpop.eup %2041  ;;  %2049 = vrcp.f32 %v1190_v49 }
 0x4d2   : > { %v935_v51 = vmul.f32 %v2042_v50, %v926_v17  ;;  %2051 = vrcp.f32 %v1326_v48  ;;  %v2044_v58 = vpop.eup %2043  ;;  %v1471_v48 = vld [vmem:[%s2423_s10 + $0x10] sm:$0xff] (!%p1785_p5) }
 0x4d3   : > { %v2013_v55 = vpop.permute.xlu0 %2012  ;;  %v1064_v63 = vmul.f32 %v2044_v58, %v2315_v15  ;;  %v1964_v49 = vpack.c.bf16 (!%p1785_p5), %v1472_v60, %v1471_v48 }
 0x4d4   : > { %v2015_v42 = vunpack.i.h.bf16 %v2013_v55  ;;  %v2014_v56 = vunpack.i.l.bf16 %v2013_v55  ;;  %1879 = vmatprep.mubr.msk.f32.mxu1 %vm913_vm9, %v935_v51  ;;  %v1323_v57 = vpop.xlane.xlu1 %1322 }
 0x4d5   : > { %2053 = vrcp.f32 %v1323_v57  ;;  %1880 = vmatmul.mubr.msk.f32.vlgmr.msra.gmra.mrb[2].mxu1 %vm913_vm9, %v937_v52 }
 0x4d6   : > { %v2046_v59 = vpop.eup %2045  ;;  %v1949_v61 = vpack.c.bf16 %v2015_v42, %v2014_v56  ;;  %1948 = vmatpush3.bf16.msra.mxu1 %v1945_v30  ;;  %v1453_v30 = vrot.slane %v2250_v24, %v1162_v53  ;;  %v2112_v53 = vmov (!%p1785_p5), 0.0|0.0  }
 0x4d7   : > { %v1062_v62 = vmul.f32 %v2046_v59, %v1053_v32  ;;  %v2048_v3 = vpop.eup %2047 }
 0x4d8   : > { %v2018_v0 = vpop.permute.xlu1 %2017  ;;  %1950 = vmatprep.subr.bf16.mxu0 %v1949_v61  ;;  %v1197_v7 = vmul.f32 %v2048_v3, %v2322_v28 }
 0x4d9   : > { %v2020_v1 = vunpack.i.h.bf16 %v2018_v0  ;;  %v2019_v2 = vunpack.i.l.bf16 %v2018_v0  ;;  %1886 = vmatprep.mubr.msk.f32.mxu1 %vm913_vm9, %v1062_v62  ;;  %1952 = vmatpush3.bf16.msra.mxu0 %v1949_v61 }
 0x4da   : > { %1887 = vmatmul.mubr.msk.f32.vlgmr.msra.gmra.mrb[4].mxu1 %vm913_vm9, %v1064_v63  ;;  %1957 = vmatprep.subr.bf16.mxu0 (!%p1785_p5), %v2112_v53 }
 0x4db   : > { %v2050_v4 = vpop.eup %2049  ;;  %v1953_v5 = vpack.c.bf16 %v2020_v1, %v2019_v2 }
 0x4dc   : > { %v1195_v6 = vmul.f32 %v2050_v4, %v1186_v37  ;;  %v2052_v8 = vpop.eup %2051 }
 0x4dd   : > { %1954 = vmatprep.subr.bf16.mxu1 %v1953_v5  ;;  %v1330_v11 = vmul.f32 %v2052_v8, %v2329_v36 }
 0x4de   : > { %1893 = vmatprep.mubr.msk.f32.mxu0 %vm913_vm9, %v1195_v6  ;;  %1956 = vmatpush3.bf16.msra.mxu1 %v1953_v5 }
 0x4df   : > { %v2054_v9 = vpop.eup %2053  ;;  %1894 = vmatmul.mubr.msk.f32.vlgmr.msra.gmra.mrb[4].mxu0 %vm913_vm9, %v1197_v7  ;;  %1960 = vmatprep.subr.bf16.mxu1 (!%p1785_p5), %v2112_v53 }
 0x4e0   : > { %v1328_v10 = vmul.f32 %v2054_v9, %v1319_v41  ;;  %1907 = vmatprep.mubr.msk.f32.mxu0 (!%p1785_p5), %vm2113_vm4, %v2114_v43  ;;  %v1468_v9 = vld [vmem:[%s2422_s9] sm:$0x3] (!%p1785_p5) }
 0x4e2   : > { %1900 = vmatprep.mubr.msk.f32.mxu1 %vm913_vm9, %v1328_v10  ;;  %v1573_v10 = vrot.slane (!%p1785_p5), %v1468_v9, %v2247_v23 }
 0x4e3   : > { %1901 = vmatmul.mubr.msk.f32.vlgmr.msra.gmra.mrb[6].mxu1 %vm913_vm9, %v1330_v11 }
 0x4e4   : > { %1918 = vmatprep.mubr.msk.f32.mxu1 (!%p1785_p5), %vm2113_vm4, %v2114_v43  ;;  %1962 = vmatpush3.bf16.msra.mxu1 (!%p1785_p5), %v1961_v47 }
 0x4e5   : > { %1963 = vmatprep.subr.bf16.mxu1 (!%p1785_p5), %v2112_v53 }
 0x4e8   : > { %1965 = vmatpush3.bf16.msra.mxu1 (!%p1785_p5), %v1964_v49 }
 0x5a8   : > { %v1881_v12 = vpop.f32.mrb[2].mxu1 }
 0x5a9   : > { %v1010_v13 = vpop.f32.mrb[3].mxu1 }
 0x5ad   : > { %v1888_v14 = vpop.f32.mrb[4].mxu1 }
 0x5ae   : > { %v1143_v15 = vpop.f32.mrb[5].mxu1 }
 0x5b2   : > { %v1895_v16 = vpop.f32.mrb[4].mxu0 }
 0x5b3   : > { %1430 = vrot.lane.b32.xlu0 %v1895_v16, %s2109_s17  ;;  %v1276_v17 = vpop.f32.mrb[5].mxu0  ;;  %v1787_v16 = vld [vmem:[%s2424_s11] ss:$0 sm:$0xff] (!%p1785_p5) }
 0x5b4   : > { %1428 = vrot.lane.b32.xlu1 %v1276_v17, %s2109_s17 }
 0x5b6   : > { %v1902_v18 = vpop.f32.mrb[6].mxu1 }
 0x5b7   : > { %1422 = vrot.lane.b32.xlu0 %v1888_v14, %s2110_s18  ;;  %v1409_v19 = vpop.f32.mrb[7].mxu1 }
 0x5b8   : > { %1420 = vrot.lane.b32.xlu1 %v1143_v15, %s2110_s18 }
 0x5bb   : > { %1438 = vrot.lane.b32.xlu0 %v1902_v18, %s2111_s19 }
 0x5bc   : > { %1436 = vrot.lane.b32.xlu1 %v1409_v19, %s2111_s19 }
 0x625   : > { %v1431_v20 = vpop.permute.xlu0 %1430 }
 0x626   : > { %v1429_v21 = vpop.permute.xlu1 %1428 }
 0x629   : > { %v1423_v26 = vpop.permute.xlu0 %1422 }
 0x62a   : > { %v1444_v27 = vsel %vm1442_vm1, %v1881_v12, %v1423_v26  ;;  %v1421_v28 = vpop.permute.xlu1 %1420 }
 0x62b   : > { %v1443_v29 = vsel %vm1442_vm1, %v1010_v13, %v1421_v28  ;;  %v1446_v31 = vsel %vm913_vm9, %v1444_v27, %v1431_v20  ;;  %v1578_v13 = vrot.slane (!%p1785_p5), %v1468_v9, %v2253_v25 }
 0x62c   : > { %v1445_v34 = vsel %vm913_vm9, %v1443_v29, %v1429_v21 }
 0x62d   : > { %v1439_v32 = vpop.permute.xlu0 %1438 }
 0x62e   : > { %v1449_v33 = vsel %vm1447_vm2, %v1446_v31, %v1439_v32  ;;  %v1437_v35 = vpop.permute.xlu1 %1436  ;;  %1463 = sbr.rel (%p1785_p5) target bundleno = 2399 (0x95f), region = 76 }
 0x62f   : > { %v1455_v36 = vadd.f32 %v1453_v30, %v1449_v33  ;;  %v1448_v37 = vsel %vm1447_vm2, %v1445_v34, %v1437_v35 }
 0x630   : > { %v1454_v38 = vadd.f32 %v1453_v30, %v1448_v37 }
 0x631   : > { %v1457_v39 = vmax.f32 %v1455_v36, 0.0 }
 0x632   : > { %v1456_v40 = vmax.f32 %v1454_v38, 0.0 }
 0x633   : > { %1459 = vst.msk [vmem:[#allocation2 + $0x8] sm:$0xff] %vm612_vm3, %v1457_v39 }
 0x634   : > { %1458 = vst.msk [vmem:[#allocation2] sm:$0xff] %vm612_vm3, %v1456_v40 }
 0x63a   : > { %v1465_v24 = vld [vmem:[#allocation2 + $0x8] sm:$0xff] }
 0x63b   : > { %v1464_v22 = vld [vmem:[#allocation2] sm:$0xff] }
 0x63c   : > { %v1958_v41 = vpack.c.bf16 %v1465_v24, %v1464_v22 }
 0x63e   : > { %1959 = vmatpush3.bf16.msra.mxu0 %v1958_v41 }
 0x641   : > { %1908 = vmatmul.mubr.msk.f32.vlgmr.msra.gmra.mrb[0].mxu0 %vm913_vm9, %v1467_v44 }
 0x714   : > { %v1543_v50 = vpop.f32.mrb[0].mxu0 }
 0x715   : > { %v1548_v51 = vsel %vm1547_vm5, %v1543_v50, 0.0  ;;  %v1909_v52 = vpop.f32.mrb[1].mxu0 }
 0x716   : > { %v1549_v55 = vrot.slane %v1548_v51, 4 }
 0x718   : > { %v1550_v42 = vadd.f32 %v1549_v55, %v1548_v51 }
 0x71a   : > { %v1551_v56 = vrot.slane %v1550_v42, 2 }
 0x71c   : > { %v1552_v57 = vadd.f32 %v1551_v56, %v1550_v42 }
 0x71e   : > { %v1553_v58 = vrot.slane %v1552_v57, 1 }
 0x720   : > { %v1554_v59 = vadd.f32 %v1553_v58, %v1552_v57 }
 0x722   : > { %v1556_v61 = vmul.f32 0.5, %v1554_v59 }
 0x724   : > { %v1557_v62 = vsub.f32 %v1543_v50, %v1556_v61 }
 0x726   : > { %v1558_v63 = vmul.f32 %v1557_v62, %v1557_v62 }
 0x728   : > { %v1559_v0 = vsel %vm1547_vm5, %v1558_v63, 0.0 }
 0x729   : > { %v1560_v1 = vrot.slane %v1559_v0, 4 }
 0x72b   : > { %v1561_v2 = vadd.f32 %v1560_v1, %v1559_v0 }
 0x72d   : > { %v1562_v3 = vrot.slane %v1561_v2, 2 }
 0x72f   : > { %v1563_v4 = vadd.f32 %v1562_v3, %v1561_v2 }
 0x731   : > { %v1564_v5 = vrot.slane %v1563_v4, 1 }
 0x733   : > { %v1565_v6 = vadd.f32 %v1564_v5, %v1563_v4 }
 0x735   : > { %v1566_v7 = vmul.f32 0.5, %v1565_v6 }
 0x737   : > { %v1567_v8 = vadd.f32 1e-05, %v1566_v7 }
 0x739   : > { %2055 = vrsqrt.f32 %v1567_v8 }
 0x743   : > { %v2056_v11 = vpop.eup %2055 }
 0x744   : > { %v1569_v12 = vmul.f32 %v2056_v11, %v1557_v62 }
 0x746   : > { %v1574_v14 = vmul.f32 %v1573_v10, %v1569_v12 }
 0x748   : > { %v1579_v15 = vadd.f32 %v1578_v13, %v1574_v14 }
 0x74a   : > { %1919 = vmatmul.mubr.msk.f32.vlgmr.msra.gmra.mrb[0].mxu1 %vm612_vm3, %v1579_v15 }
 0x81d   : > { %v1655_v17 = vpop.f32.mrb[0].mxu1 }
 0x81e   : > { %v1656_v18 = vadd.f32 %v1787_v16, %v1655_v17  ;;  %v1920_v19 = vpop.f32.mrb[1].mxu1 }
 0x820   : > { %v1660_v20 = vsel %vm1659_vm6, %v1656_v18, -inf }
 0x821   : > { %1661 = vmax.xlane.f32.xlu0 %v1660_v20 }
 0x8ae   : > { %v1662_v23 = vpop.xlane.xlu0 %1661 }
 0x8af   : > { %v1663_v21 = vsub.f32 %v1656_v18, %v1662_v23 }
 0x8b1   : > { %v1664_v26 = vmul.f32 1.442695, %v1663_v21 }
 0x8b3   : > { %2057 = vpow2.f32 %v1664_v26 }
 0x8bd   : > { %v2058_v25 = vpop.eup %2057 }
 0x8be   : > { %v1666_v27 = vsel %vm1659_vm6, %v2058_v25, 0.0 }
 0x8bf   : > { %1667 = vadd.xlane.f32.xlu0 %v1666_v27 }
 0x94c   : > { %v1668_v28 = vpop.xlane.xlu0 %1667 }
 0x94d   : > { %2059 = vlog2.f32 %v1668_v28 }
 0x957   : > { %v2060_v29 = vpop.eup %2059 }
 0x958   : > { %v1670_v30 = vmul.f32 0.6931472, %v2060_v29 }
 0x95a   : > { %v1671_v31 = vadd.f32 %v1670_v30, %v1662_v23 }
 0x95c   : > { %v1672_v32 = vsub.f32 %v1656_v18, %v1671_v31 }
 0x95e   : > { %1673 = vst.msk [vmem:[#allocation3] sm:$0x3] %vm1659_vm6, %v1672_v32 }
 0x95f PF: > { %p1970_p6 = scmp.eq.s32.totalorder %s2187_s22, 2  ;;  %s2115_s18 = smov [#allocation3]  }
 0x960   : > { %s1681_s19 = sshll.u32 %s2115_s18, 4  ;;  %s1682_s19 = int_to_ptr.vmem [resolvable:$true] %s1681_s19 }
 0x961   : > { %s2061_s20 = scalar_lea.vmem %s1682_s19, 32  ;;  %p2068_p10 = scmp.lt.s32.totalorder %s1682_s19, %s1682_s19 }
 0x962   : > { %p2062_p7 = scmp.ne.s32.totalorder %s1682_s19, %s2061_s20  ;;  %p2069_p11 = scmp.lt.s32.totalorder %s2061_s20, %s2061_s20 }
 0x964   : > { %p2063_p8 = pnand %p2062_p7, %p1970_p6  ;;  %p2070_p12 = por %p2069_p11, %p2068_p10 }
 0x966   : > { %p2064_p9 = pneg %p2063_p8 }
 0x968   : > { %p2071_p13 = pnand %p2070_p12, %p2064_p9 }
 0x96a   : > { %2074 = shalt.err (!%p2071_p13)
}
 0x96b   : > { %s2075_s27 = scalar_lea.hbm %s2425_s12, 32 }
 0x96c   : > { %p2076_p0 = scmp.ne.s32.totalorder %s2425_s12, %s2075_s27  ;;  %p2081_p3 = scmp.lt.u32.totalorder %s2075_s27, %s2425_s12 }
 0x96e   : > { %p2077_p1 = pnand %p2076_p0, %p1970_p6 }
 0x970   : > { %p2078_p2 = pneg %p2077_p1 }
 0x972   : > { %p2083_p4 = pnand %p2081_p3, %p2078_p2 }
 0x974   : > { %2086 = shalt.err (!%p2083_p4)
}
 0x975   : > { %1967 = dma.vmem_to_hbm [thread:$0]  (%p1970_p6), %s1682_s19, 32, %s2425_s12, [#allocation4]  }
 0x976   : > { %2092 = dma.done.wait (%p1970_p6), [#allocation4], 32  }
 0x977   : > { %2094 = vsyncadd (%p1970_p6), [#allocation4], 4294967264 }
 0x978 PF: > { %s23_s21 = sadd.s32 1, %s2097_s21  }
 0x979   : > { %p20_p5 = scmp.ge.s32.totalorder %s23_s21, 5  }
 0x97b   :  { %22 = sbr.rel (!%p20_p5) target bundleno = 1 (0x1), region = 112 }
 0x982   :  { %1694 = vsyncpa [#allocation4], 1 }
 0x983   :  { %1696 = vsyncpa [#allocation4 + $0x1], 1 }

</bundles_post_ra>
